<compile_context>
chip_gen: v7x
topology: tpu7x:2x2x1
jax: 0.10.0
libtpu: 0.0.40
codegen_flags: <defaults>
</compile_context>

<pallas_src>
import functools

import jax
import jax.numpy as jnp
import numpy as np
from jax.experimental import pallas as pl
from jax.experimental.pallas import tpu as pltpu

C = 3          # in_channels == out_channels
K = 3          # kernel size, stride=1, padding=1
KK = K * K


def _resblock_kernel(x_ref, w1_ref, b1_ref, w2_ref, b2_ref, mask_ref, out_ref,
                     *, N, H, W):
    # Packed row order everywhere: row r = n*C + c (image n, channel c).
    #   x_ref:    (NC, L_EXT)  zero-extended, flattened, spatially padded input
    #   w1_ref:   (NC, C*KK)   conv1 weights per row; column j = ci*KK + t
    #   b1_ref:   (NC, 1)      conv1 bias per row
    #   w2_ref/b2_ref:         same for conv2
    #   mask_ref: (NC, PADQ)   1.0 on interior pixels of the padded grid
    #   out_ref:  (NC, FLAT)   flattened output (row stride Wp, seam cols junk)
    NC = N * C
    Wp = W + 2
    FLAT = H * Wp                    # interior-coords flat length (row stride Wp)
    PADQ = (H + 2) * Wp + 2          # padded-grid flat length needed by conv2 taps
    offs = [kh * Wp + kw for kh in range(K) for kw in range(K)]
    c1_shift = Wp - 1                # conv1 tap base offset inside x_ext
    res_off = 3 * Wp + 1             # offset of original x (interior coords) in x_ext
    f32 = jnp.float32

    x = x_ref[...].astype(f32)       # (NC, L_EXT) -- loaded once
    w1 = w1_ref[...]
    w2 = w2_ref[...]
    mask = mask_ref[...]             # (NC, PADQ)

    def replicate_plane(src, ci):
        # (NC, width) where row n*C + co == src[n*C + ci] for every co:
        # all output-channel rows of image n see input-channel plane ci.
        width = src.shape[1]
        blocks = []
        for n in range(N):
            row = src[n * C + ci:n * C + ci + 1, :]            # (1, width)
            blocks.append(jnp.broadcast_to(row, (C, width)))   # (C, width)
        return jnp.concatenate(blocks, axis=0)                 # (NC, width)

    def conv(src, base, out_len, w, b):
        # acc[r, p] = b[r] + sum_{ci,t} w[r, ci*KK+t] * src[(n, ci) row, base + offs[t] + p]
        acc = jnp.broadcast_to(b, (NC, out_len)).astype(f32)
        for ci in range(C):
            plane = replicate_plane(src, ci)                   # replicated once per ci
            for t, o in enumerate(offs):
                j = ci * KK + t
                tap = plane[:, base + o:base + o + out_len]    # sliced once per (ci, t)
                acc = acc + w[:, j:j + 1] * tap                # one packed FMA per (ci, t)
        return acc

    # conv1 + ReLU, evaluated on the padded-output grid.  Masking to the
    # interior makes it double as conv2's zero-padded flattened input, so it
    # never needs a VMEM scratch round trip.
    mid = jnp.maximum(conv(x, c1_shift, PADQ, w1, b1_ref[...]), 0.0) * mask
    # conv2 + ReLU + residual add, evaluated on the interior grid.
    acc2 = conv(mid, 0, FLAT, w2, b2_ref[...])
    res = x[:, res_off:res_off + FLAT]
    out_ref[...] = (jnp.maximum(acc2, 0.0) + res).astype(out_ref.dtype)


def residual_block(x, w1, b1, w2, b2):
    N, Cx, H, W = x.shape
    assert Cx == C
    NC = N * C
    Wp = W + 2
    FLAT = H * Wp
    PADQ = (H + 2) * Wp + 2
    L_EXT = (H + 6) * Wp             # pad H by (3,3), W by (1,1): covers all tap reads

    # --- pre-kernel: ONE pad + free reshape (row order (n, c) -> no transpose) ---
    xp = jnp.pad(x.astype(jnp.float32), ((0, 0), (0, 0), (3, 3), (1, 1)))
    x_ext = xp.reshape(NC, L_EXT)

    # --- packed per-row parameters (tiny): row n*C + co carries channel co ---
    w1p = jnp.tile(w1.astype(jnp.float32).reshape(C, C * KK), (N, 1))   # (NC, C*KK)
    w2p = jnp.tile(w2.astype(jnp.float32).reshape(C, C * KK), (N, 1))
    b1p = jnp.tile(b1.astype(jnp.float32).reshape(C, 1), (N, 1))        # (NC, 1)
    b2p = jnp.tile(b2.astype(jnp.float32).reshape(C, 1), (N, 1))

    # --- interior mask of the padded (H+2, Wp) grid, flat coordinates (constant) ---
    q = np.arange(PADQ)
    r, c = q // Wp, q % Wp
    mask_row = ((r >= 1) & (r <= H) & (c >= 1) & (c <= W)).astype(np.float32)
    mask = jnp.asarray(np.tile(mask_row, (NC, 1)))                      # (NC, PADQ)

    kernel = functools.partial(_resblock_kernel, N=N, H=H, W=W)
    vmem = pl.BlockSpec(memory_space=pltpu.MemorySpace.VMEM)
    out_flat = pl.pallas_call(
        kernel,
        out_shape=jax.ShapeDtypeStruct((NC, FLAT), jnp.float32),
        in_specs=[vmem] * 6,
        out_specs=vmem,
    )(x_ext, w1p, b1p, w2p, b2p, mask)

    # --- post-kernel: free reshape + ONE slice (drops the 2 seam columns) ---
    out = out_flat.reshape(N, C, H, Wp)[..., :W]
    return out.astype(x.dtype)


def reference(x, w1, b1, w2, b2):
    dn = ("NCHW", "OIHW", "NCHW")
    out = jax.lax.conv_general_dilated(
        x, w1, (1, 1), [(1, 1), (1, 1)], dimension_numbers=dn
    ) + b1[None, :, None, None]
    out = jnp.maximum(out, 0.0)
    out = jax.lax.conv_general_dilated(
        out, w2, (1, 1), [(1, 1), (1, 1)], dimension_numbers=dn
    ) + b2[None, :, None, None]
    return jnp.maximum(out, 0.0) + x


if __name__ == "__main__":
    key = jax.random.PRNGKey(0)
    k1, k2, k3, k4, k5 = jax.random.split(key, 5)

    N, H, W = 2, 16, 16
    x = jax.random.normal(k1, (N, C, H, W), jnp.float32)

    # Deterministic synthetic parameters matching nn.Conv2d(3, 3, 3, padding=1)
    fan_in = C * K * K
    bound = 1.0 / np.sqrt(fan_in)
    w1 = jax.random.uniform(k2, (C, C, K, K), jnp.float32, -bound, bound)
    b1 = jax.random.uniform(k3, (C,), jnp.float32, -bound, bound)
    w2 = jax.random.uniform(k4, (C, C, K, K), jnp.float32, -bound, bound)
    b2 = jax.random.uniform(k5, (C,), jnp.float32, -bound, bound)

    out = residual_block(x, w1, b1, w2, b2)
    jax.block_until_ready(out)

    ref = reference(x, w1, b1, w2, b2)
    np.testing.assert_allclose(np.asarray(out), np.asarray(ref), atol=1e-5, rtol=1e-5)
    print("KERNEL_OK")
</pallas_src>

<mosaic_0001>
module attributes {stable_mosaic.version = 11 : i64} {
  func.func @_resblock_kernel(%arg0: memref<6x396xf32, #tpu.memory_space<vmem>>, %arg1: memref<6x27xf32, #tpu.memory_space<vmem>>, %arg2: memref<6x1xf32, #tpu.memory_space<vmem>>, %arg3: memref<6x27xf32, #tpu.memory_space<vmem>>, %arg4: memref<6x1xf32, #tpu.memory_space<vmem>>, %arg5: memref<6x326xf32, #tpu.memory_space<vmem>>, %arg6: memref<6x288xf32, #tpu.memory_space<vmem>>) attributes {dimension_semantics = [], scalar_prefetch = 0 : i64, scratch_operands = 0 : i64, tpu.core_type = #tpu.core_type<tc>} {
    %c0 = arith.constant 0 : index
    %c0_0 = arith.constant 0 : index
    %0 = vector.load %arg0[%c0, %c0_0] : memref<6x396xf32, #tpu.memory_space<vmem>>, vector<6x396xf32>
    %c0_1 = arith.constant 0 : index
    %c0_2 = arith.constant 0 : index
    %1 = vector.load %arg1[%c0_1, %c0_2] : memref<6x27xf32, #tpu.memory_space<vmem>>, vector<6x27xf32>
    %c0_3 = arith.constant 0 : index
    %c0_4 = arith.constant 0 : index
    %2 = vector.load %arg3[%c0_3, %c0_4] : memref<6x27xf32, #tpu.memory_space<vmem>>, vector<6x27xf32>
    %c0_5 = arith.constant 0 : index
    %c0_6 = arith.constant 0 : index
    %3 = vector.load %arg5[%c0_5, %c0_6] : memref<6x326xf32, #tpu.memory_space<vmem>>, vector<6x326xf32>
    %c0_7 = arith.constant 0 : index
    %c0_8 = arith.constant 0 : index
    %4 = vector.load %arg2[%c0_7, %c0_8] : memref<6x1xf32, #tpu.memory_space<vmem>>, vector<6x1xf32>
    %5 = vector.shape_cast %4 : vector<6x1xf32> to vector<6x1xf32>
    %6 = vector.broadcast %5 : vector<6x1xf32> to vector<6x326xf32>
    %7 = vector.extract_strided_slice %0 {offsets = [0, 0], sizes = [1, 396], strides = [1, 1]} : vector<6x396xf32> to vector<1x396xf32>
    %8 = vector.shape_cast %7 : vector<1x396xf32> to vector<1x396xf32>
    %9 = vector.broadcast %8 : vector<1x396xf32> to vector<3x396xf32>
    %10 = vector.extract_strided_slice %0 {offsets = [3, 0], sizes = [1, 396], strides = [1, 1]} : vector<6x396xf32> to vector<1x396xf32>
    %11 = vector.shape_cast %10 : vector<1x396xf32> to vector<1x396xf32>
    %12 = vector.broadcast %11 : vector<1x396xf32> to vector<3x396xf32>
    %13 = tpu.concatenate %9, %12 in 0 : vector<3x396xf32>, vector<3x396xf32> -> vector<6x396xf32>
    %14 = vector.extract_strided_slice %13 {offsets = [0, 17], sizes = [6, 326], strides = [1, 1]} : vector<6x396xf32> to vector<6x326xf32>
    %15 = vector.extract_strided_slice %1 {offsets = [0, 0], sizes = [6, 1], strides = [1, 1]} : vector<6x27xf32> to vector<6x1xf32>
    %16 = vector.broadcast %15 : vector<6x1xf32> to vector<6x326xf32>
    %17 = arith.mulf %16, %14 : vector<6x326xf32>
    %18 = arith.addf %6, %17 : vector<6x326xf32>
    %19 = vector.extract_strided_slice %13 {offsets = [0, 18], sizes = [6, 326], strides = [1, 1]} : vector<6x396xf32> to vector<6x326xf32>
    %20 = vector.extract_strided_slice %1 {offsets = [0, 1], sizes = [6, 1], strides = [1, 1]} : vector<6x27xf32> to vector<6x1xf32>
    %21 = vector.broadcast %20 : vector<6x1xf32> to vector<6x326xf32>
    %22 = arith.mulf %21, %19 : vector<6x326xf32>
    %23 = arith.addf %18, %22 : vector<6x326xf32>
    %24 = vector.extract_strided_slice %13 {offsets = [0, 19], sizes = [6, 326], strides = [1, 1]} : vector<6x396xf32> to vector<6x326xf32>
    %25 = vector.extract_strided_slice %1 {offsets = [0, 2], sizes = [6, 1], strides = [1, 1]} : vector<6x27xf32> to vector<6x1xf32>
    %26 = vector.broadcast %25 : vector<6x1xf32> to vector<6x326xf32>
    %27 = arith.mulf %26, %24 : vector<6x326xf32>
    %28 = arith.addf %23, %27 : vector<6x326xf32>
    %29 = vector.extract_strided_slice %13 {offsets = [0, 35], sizes = [6, 326], strides = [1, 1]} : vector<6x396xf32> to vector<6x326xf32>
    %30 = vector.extract_strided_slice %1 {offsets = [0, 3], sizes = [6, 1], strides = [1, 1]} : vector<6x27xf32> to vector<6x1xf32>
    %31 = vector.broadcast %30 : vector<6x1xf32> to vector<6x326xf32>
    %32 = arith.mulf %31, %29 : vector<6x326xf32>
    %33 = arith.addf %28, %32 : vector<6x326xf32>
    %34 = vector.extract_strided_slice %13 {offsets = [0, 36], sizes = [6, 326], strides = [1, 1]} : vector<6x396xf32> to vector<6x326xf32>
    %35 = vector.extract_strided_slice %1 {offsets = [0, 4], sizes = [6, 1], strides = [1, 1]} : vector<6x27xf32> to vector<6x1xf32>
    %36 = vector.broadcast %35 : vector<6x1xf32> to vector<6x326xf32>
    %37 = arith.mulf %36, %34 : vector<6x326xf32>
    %38 = arith.addf %33, %37 : vector<6x326xf32>
    %39 = vector.extract_strided_slice %13 {offsets = [0, 37], sizes = [6, 326], strides = [1, 1]} : vector<6x396xf32> to vector<6x326xf32>
    %40 = vector.extract_strided_slice %1 {offsets = [0, 5], sizes = [6, 1], strides = [1, 1]} : vector<6x27xf32> to vector<6x1xf32>
    %41 = vector.broadcast %40 : vector<6x1xf32> to vector<6x326xf32>
    %42 = arith.mulf %41, %39 : vector<6x326xf32>
    %43 = arith.addf %38, %42 : vector<6x326xf32>
    %44 = vector.extract_strided_slice %13 {offsets = [0, 53], sizes = [6, 326], strides = [1, 1]} : vector<6x396xf32> to vector<6x326xf32>
    %45 = vector.extract_strided_slice %1 {offsets = [0, 6], sizes = [6, 1], strides = [1, 1]} : vector<6x27xf32> to vector<6x1xf32>
    %46 = vector.broadcast %45 : vector<6x1xf32> to vector<6x326xf32>
    %47 = arith.mulf %46, %44 : vector<6x326xf32>
    %48 = arith.addf %43, %47 : vector<6x326xf32>
    %49 = vector.extract_strided_slice %13 {offsets = [0, 54], sizes = [6, 326], strides = [1, 1]} : vector<6x396xf32> to vector<6x326xf32>
    %50 = vector.extract_strided_slice %1 {offsets = [0, 7], sizes = [6, 1], strides = [1, 1]} : vector<6x27xf32> to vector<6x1xf32>
    %51 = vector.broadcast %50 : vector<6x1xf32> to vector<6x326xf32>
    %52 = arith.mulf %51, %49 : vector<6x326xf32>
    %53 = arith.addf %48, %52 : vector<6x326xf32>
    %54 = vector.extract_strided_slice %13 {offsets = [0, 55], sizes = [6, 326], strides = [1, 1]} : vector<6x396xf32> to vector<6x326xf32>
    %55 = vector.extract_strided_slice %1 {offsets = [0, 8], sizes = [6, 1], strides = [1, 1]} : vector<6x27xf32> to vector<6x1xf32>
    %56 = vector.broadcast %55 : vector<6x1xf32> to vector<6x326xf32>
    %57 = arith.mulf %56, %54 : vector<6x326xf32>
    %58 = arith.addf %53, %57 : vector<6x326xf32>
    %59 = vector.extract_strided_slice %0 {offsets = [1, 0], sizes = [1, 396], strides = [1, 1]} : vector<6x396xf32> to vector<1x396xf32>
    %60 = vector.shape_cast %59 : vector<1x396xf32> to vector<1x396xf32>
    %61 = vector.broadcast %60 : vector<1x396xf32> to vector<3x396xf32>
    %62 = vector.extract_strided_slice %0 {offsets = [4, 0], sizes = [1, 396], strides = [1, 1]} : vector<6x396xf32> to vector<1x396xf32>
    %63 = vector.shape_cast %62 : vector<1x396xf32> to vector<1x396xf32>
    %64 = vector.broadcast %63 : vector<1x396xf32> to vector<3x396xf32>
    %65 = tpu.concatenate %61, %64 in 0 : vector<3x396xf32>, vector<3x396xf32> -> vector<6x396xf32>
    %66 = vector.extract_strided_slice %65 {offsets = [0, 17], sizes = [6, 326], strides = [1, 1]} : vector<6x396xf32> to vector<6x326xf32>
    %67 = vector.extract_strided_slice %1 {offsets = [0, 9], sizes = [6, 1], strides = [1, 1]} : vector<6x27xf32> to vector<6x1xf32>
    %68 = vector.broadcast %67 : vector<6x1xf32> to vector<6x326xf32>
    %69 = arith.mulf %68, %66 : vector<6x326xf32>
    %70 = arith.addf %58, %69 : vector<6x326xf32>
    %71 = vector.extract_strided_slice %65 {offsets = [0, 18], sizes = [6, 326], strides = [1, 1]} : vector<6x396xf32> to vector<6x326xf32>
    %72 = vector.extract_strided_slice %1 {offsets = [0, 10], sizes = [6, 1], strides = [1, 1]} : vector<6x27xf32> to vector<6x1xf32>
    %73 = vector.broadcast %72 : vector<6x1xf32> to vector<6x326xf32>
    %74 = arith.mulf %73, %71 : vector<6x326xf32>
    %75 = arith.addf %70, %74 : vector<6x326xf32>
    %76 = vector.extract_strided_slice %65 {offsets = [0, 19], sizes = [6, 326], strides = [1, 1]} : vector<6x396xf32> to vector<6x326xf32>
    %77 = vector.extract_strided_slice %1 {offsets = [0, 11], sizes = [6, 1], strides = [1, 1]} : vector<6x27xf32> to vector<6x1xf32>
    %78 = vector.broadcast %77 : vector<6x1xf32> to vector<6x326xf32>
    %79 = arith.mulf %78, %76 : vector<6x326xf32>
    %80 = arith.addf %75, %79 : vector<6x326xf32>
    %81 = vector.extract_strided_slice %65 {offsets = [0, 35], sizes = [6, 326], strides = [1, 1]} : vector<6x396xf32> to vector<6x326xf32>
    %82 = vector.extract_strided_slice %1 {offsets = [0, 12], sizes = [6, 1], strides = [1, 1]} : vector<6x27xf32> to vector<6x1xf32>
    %83 = vector.broadcast %82 : vector<6x1xf32> to vector<6x326xf32>
    %84 = arith.mulf %83, %81 : vector<6x326xf32>
    %85 = arith.addf %80, %84 : vector<6x326xf32>
    %86 = vector.extract_strided_slice %65 {offsets = [0, 36], sizes = [6, 326], strides = [1, 1]} : vector<6x396xf32> to vector<6x326xf32>
    %87 = vector.extract_strided_slice %1 {offsets = [0, 13], sizes = [6, 1], strides = [1, 1]} : vector<6x27xf32> to vector<6x1xf32>
    %88 = vector.broadcast %87 : vector<6x1xf32> to vector<6x326xf32>
    %89 = arith.mulf %88, %86 : vector<6x326xf32>
    %90 = arith.addf %85, %89 : vector<6x326xf32>
    %91 = vector.extract_strided_slice %65 {offsets = [0, 37], sizes = [6, 326], strides = [1, 1]} : vector<6x396xf32> to vector<6x326xf32>
    %92 = vector.extract_strided_slice %1 {offsets = [0, 14], sizes = [6, 1], strides = [1, 1]} : vector<6x27xf32> to vector<6x1xf32>
    %93 = vector.broadcast %92 : vector<6x1xf32> to vector<6x326xf32>
    %94 = arith.mulf %93, %91 : vector<6x326xf32>
    %95 = arith.addf %90, %94 : vector<6x326xf32>
    %96 = vector.extract_strided_slice %65 {offsets = [0, 53], sizes = [6, 326], strides = [1, 1]} : vector<6x396xf32> to vector<6x326xf32>
    %97 = vector.extract_strided_slice %1 {offsets = [0, 15], sizes = [6, 1], strides = [1, 1]} : vector<6x27xf32> to vector<6x1xf32>
    %98 = vector.broadcast %97 : vector<6x1xf32> to vector<6x326xf32>
    %99 = arith.mulf %98, %96 : vector<6x326xf32>
    %100 = arith.addf %95, %99 : vector<6x326xf32>
    %101 = vector.extract_strided_slice %65 {offsets = [0, 54], sizes = [6, 326], strides = [1, 1]} : vector<6x396xf32> to vector<6x326xf32>
    %102 = vector.extract_strided_slice %1 {offsets = [0, 16], sizes = [6, 1], strides = [1, 1]} : vector<6x27xf32> to vector<6x1xf32>
    %103 = vector.broadcast %102 : vector<6x1xf32> to vector<6x326xf32>
    %104 = arith.mulf %103, %101 : vector<6x326xf32>
    %105 = arith.addf %100, %104 : vector<6x326xf32>
    %106 = vector.extract_strided_slice %65 {offsets = [0, 55], sizes = [6, 326], strides = [1, 1]} : vector<6x396xf32> to vector<6x326xf32>
    %107 = vector.extract_strided_slice %1 {offsets = [0, 17], sizes = [6, 1], strides = [1, 1]} : vector<6x27xf32> to vector<6x1xf32>
    %108 = vector.broadcast %107 : vector<6x1xf32> to vector<6x326xf32>
    %109 = arith.mulf %108, %106 : vector<6x326xf32>
    %110 = arith.addf %105, %109 : vector<6x326xf32>
    %111 = vector.extract_strided_slice %0 {offsets = [2, 0], sizes = [1, 396], strides = [1, 1]} : vector<6x396xf32> to vector<1x396xf32>
    %112 = vector.shape_cast %111 : vector<1x396xf32> to vector<1x396xf32>
    %113 = vector.broadcast %112 : vector<1x396xf32> to vector<3x396xf32>
    %114 = vector.extract_strided_slice %0 {offsets = [5, 0], sizes = [1, 396], strides = [1, 1]} : vector<6x396xf32> to vector<1x396xf32>
    %115 = vector.shape_cast %114 : vector<1x396xf32> to vector<1x396xf32>
    %116 = vector.broadcast %115 : vector<1x396xf32> to vector<3x396xf32>
    %117 = tpu.concatenate %113, %116 in 0 : vector<3x396xf32>, vector<3x396xf32> -> vector<6x396xf32>
    %118 = vector.extract_strided_slice %117 {offsets = [0, 17], sizes = [6, 326], strides = [1, 1]} : vector<6x396xf32> to vector<6x326xf32>
    %119 = vector.extract_strided_slice %1 {offsets = [0, 18], sizes = [6, 1], strides = [1, 1]} : vector<6x27xf32> to vector<6x1xf32>
    %120 = vector.broadcast %119 : vector<6x1xf32> to vector<6x326xf32>
    %121 = arith.mulf %120, %118 : vector<6x326xf32>
    %122 = arith.addf %110, %121 : vector<6x326xf32>
    %123 = vector.extract_strided_slice %117 {offsets = [0, 18], sizes = [6, 326], strides = [1, 1]} : vector<6x396xf32> to vector<6x326xf32>
    %124 = vector.extract_strided_slice %1 {offsets = [0, 19], sizes = [6, 1], strides = [1, 1]} : vector<6x27xf32> to vector<6x1xf32>
    %125 = vector.broadcast %124 : vector<6x1xf32> to vector<6x326xf32>
    %126 = arith.mulf %125, %123 : vector<6x326xf32>
    %127 = arith.addf %122, %126 : vector<6x326xf32>
    %128 = vector.extract_strided_slice %117 {offsets = [0, 19], sizes = [6, 326], strides = [1, 1]} : vector<6x396xf32> to vector<6x326xf32>
    %129 = vector.extract_strided_slice %1 {offsets = [0, 20], sizes = [6, 1], strides = [1, 1]} : vector<6x27xf32> to vector<6x1xf32>
    %130 = vector.broadcast %129 : vector<6x1xf32> to vector<6x326xf32>
    %131 = arith.mulf %130, %128 : vector<6x326xf32>
    %132 = arith.addf %127, %131 : vector<6x326xf32>
    %133 = vector.extract_strided_slice %117 {offsets = [0, 35], sizes = [6, 326], strides = [1, 1]} : vector<6x396xf32> to vector<6x326xf32>
    %134 = vector.extract_strided_slice %1 {offsets = [0, 21], sizes = [6, 1], strides = [1, 1]} : vector<6x27xf32> to vector<6x1xf32>
    %135 = vector.broadcast %134 : vector<6x1xf32> to vector<6x326xf32>
    %136 = arith.mulf %135, %133 : vector<6x326xf32>
    %137 = arith.addf %132, %136 : vector<6x326xf32>
    %138 = vector.extract_strided_slice %117 {offsets = [0, 36], sizes = [6, 326], strides = [1, 1]} : vector<6x396xf32> to vector<6x326xf32>
    %139 = vector.extract_strided_slice %1 {offsets = [0, 22], sizes = [6, 1], strides = [1, 1]} : vector<6x27xf32> to vector<6x1xf32>
    %140 = vector.broadcast %139 : vector<6x1xf32> to vector<6x326xf32>
    %141 = arith.mulf %140, %138 : vector<6x326xf32>
    %142 = arith.addf %137, %141 : vector<6x326xf32>
    %143 = vector.extract_strided_slice %117 {offsets = [0, 37], sizes = [6, 326], strides = [1, 1]} : vector<6x396xf32> to vector<6x326xf32>
    %144 = vector.extract_strided_slice %1 {offsets = [0, 23], sizes = [6, 1], strides = [1, 1]} : vector<6x27xf32> to vector<6x1xf32>
    %145 = vector.broadcast %144 : vector<6x1xf32> to vector<6x326xf32>
    %146 = arith.mulf %145, %143 : vector<6x326xf32>
    %147 = arith.addf %142, %146 : vector<6x326xf32>
    %148 = vector.extract_strided_slice %117 {offsets = [0, 53], sizes = [6, 326], strides = [1, 1]} : vector<6x396xf32> to vector<6x326xf32>
    %149 = vector.extract_strided_slice %1 {offsets = [0, 24], sizes = [6, 1], strides = [1, 1]} : vector<6x27xf32> to vector<6x1xf32>
    %150 = vector.broadcast %149 : vector<6x1xf32> to vector<6x326xf32>
    %151 = arith.mulf %150, %148 : vector<6x326xf32>
    %152 = arith.addf %147, %151 : vector<6x326xf32>
    %153 = vector.extract_strided_slice %117 {offsets = [0, 54], sizes = [6, 326], strides = [1, 1]} : vector<6x396xf32> to vector<6x326xf32>
    %154 = vector.extract_strided_slice %1 {offsets = [0, 25], sizes = [6, 1], strides = [1, 1]} : vector<6x27xf32> to vector<6x1xf32>
    %155 = vector.broadcast %154 : vector<6x1xf32> to vector<6x326xf32>
    %156 = arith.mulf %155, %153 : vector<6x326xf32>
    %157 = arith.addf %152, %156 : vector<6x326xf32>
    %158 = vector.extract_strided_slice %117 {offsets = [0, 55], sizes = [6, 326], strides = [1, 1]} : vector<6x396xf32> to vector<6x326xf32>
    %159 = vector.extract_strided_slice %1 {offsets = [0, 26], sizes = [6, 1], strides = [1, 1]} : vector<6x27xf32> to vector<6x1xf32>
    %160 = vector.broadcast %159 : vector<6x1xf32> to vector<6x326xf32>
    %161 = arith.mulf %160, %158 : vector<6x326xf32>
    %162 = arith.addf %157, %161 : vector<6x326xf32>
    %cst = arith.constant 0.000000e+00 : f32
    %163 = vector.broadcast %cst : f32 to vector<6x326xf32>
    %164 = arith.maximumf %162, %163 : vector<6x326xf32>
    %165 = arith.mulf %164, %3 : vector<6x326xf32>
    %c0_9 = arith.constant 0 : index
    %c0_10 = arith.constant 0 : index
    %166 = vector.load %arg4[%c0_9, %c0_10] : memref<6x1xf32, #tpu.memory_space<vmem>>, vector<6x1xf32>
    %167 = vector.shape_cast %166 : vector<6x1xf32> to vector<6x1xf32>
    %168 = vector.broadcast %167 : vector<6x1xf32> to vector<6x288xf32>
    %169 = vector.extract_strided_slice %165 {offsets = [0, 0], sizes = [1, 326], strides = [1, 1]} : vector<6x326xf32> to vector<1x326xf32>
    %170 = vector.shape_cast %169 : vector<1x326xf32> to vector<1x326xf32>
    %171 = vector.broadcast %170 : vector<1x326xf32> to vector<3x326xf32>
    %172 = vector.extract_strided_slice %165 {offsets = [3, 0], sizes = [1, 326], strides = [1, 1]} : vector<6x326xf32> to vector<1x326xf32>
    %173 = vector.shape_cast %172 : vector<1x326xf32> to vector<1x326xf32>
    %174 = vector.broadcast %173 : vector<1x326xf32> to vector<3x326xf32>
    %175 = tpu.concatenate %171, %174 in 0 : vector<3x326xf32>, vector<3x326xf32> -> vector<6x326xf32>
    %176 = vector.extract_strided_slice %175 {offsets = [0, 0], sizes = [6, 288], strides = [1, 1]} : vector<6x326xf32> to vector<6x288xf32>
    %177 = vector.extract_strided_slice %2 {offsets = [0, 0], sizes = [6, 1], strides = [1, 1]} : vector<6x27xf32> to vector<6x1xf32>
    %178 = vector.broadcast %177 : vector<6x1xf32> to vector<6x288xf32>
    %179 = arith.mulf %178, %176 : vector<6x288xf32>
    %180 = arith.addf %168, %179 : vector<6x288xf32>
    %181 = vector.extract_strided_slice %175 {offsets = [0, 1], sizes = [6, 288], strides = [1, 1]} : vector<6x326xf32> to vector<6x288xf32>
    %182 = vector.extract_strided_slice %2 {offsets = [0, 1], sizes = [6, 1], strides = [1, 1]} : vector<6x27xf32> to vector<6x1xf32>
    %183 = vector.broadcast %182 : vector<6x1xf32> to vector<6x288xf32>
    %184 = arith.mulf %183, %181 : vector<6x288xf32>
    %185 = arith.addf %180, %184 : vector<6x288xf32>
    %186 = vector.extract_strided_slice %175 {offsets = [0, 2], sizes = [6, 288], strides = [1, 1]} : vector<6x326xf32> to vector<6x288xf32>
    %187 = vector.extract_strided_slice %2 {offsets = [0, 2], sizes = [6, 1], strides = [1, 1]} : vector<6x27xf32> to vector<6x1xf32>
    %188 = vector.broadcast %187 : vector<6x1xf32> to vector<6x288xf32>
    %189 = arith.mulf %188, %186 : vector<6x288xf32>
    %190 = arith.addf %185, %189 : vector<6x288xf32>
    %191 = vector.extract_strided_slice %175 {offsets = [0, 18], sizes = [6, 288], strides = [1, 1]} : vector<6x326xf32> to vector<6x288xf32>
    %192 = vector.extract_strided_slice %2 {offsets = [0, 3], sizes = [6, 1], strides = [1, 1]} : vector<6x27xf32> to vector<6x1xf32>
    %193 = vector.broadcast %192 : vector<6x1xf32> to vector<6x288xf32>
    %194 = arith.mulf %193, %191 : vector<6x288xf32>
    %195 = arith.addf %190, %194 : vector<6x288xf32>
    %196 = vector.extract_strided_slice %175 {offsets = [0, 19], sizes = [6, 288], strides = [1, 1]} : vector<6x326xf32> to vector<6x288xf32>
    %197 = vector.extract_strided_slice %2 {offsets = [0, 4], sizes = [6, 1], strides = [1, 1]} : vector<6x27xf32> to vector<6x1xf32>
    %198 = vector.broadcast %197 : vector<6x1xf32> to vector<6x288xf32>
    %199 = arith.mulf %198, %196 : vector<6x288xf32>
    %200 = arith.addf %195, %199 : vector<6x288xf32>
    %201 = vector.extract_strided_slice %175 {offsets = [0, 20], sizes = [6, 288], strides = [1, 1]} : vector<6x326xf32> to vector<6x288xf32>
    %202 = vector.extract_strided_slice %2 {offsets = [0, 5], sizes = [6, 1], strides = [1, 1]} : vector<6x27xf32> to vector<6x1xf32>
    %203 = vector.broadcast %202 : vector<6x1xf32> to vector<6x288xf32>
    %204 = arith.mulf %203, %201 : vector<6x288xf32>
    %205 = arith.addf %200, %204 : vector<6x288xf32>
    %206 = vector.extract_strided_slice %175 {offsets = [0, 36], sizes = [6, 288], strides = [1, 1]} : vector<6x326xf32> to vector<6x288xf32>
    %207 = vector.extract_strided_slice %2 {offsets = [0, 6], sizes = [6, 1], strides = [1, 1]} : vector<6x27xf32> to vector<6x1xf32>
    %208 = vector.broadcast %207 : vector<6x1xf32> to vector<6x288xf32>
    %209 = arith.mulf %208, %206 : vector<6x288xf32>
    %210 = arith.addf %205, %209 : vector<6x288xf32>
    %211 = vector.extract_strided_slice %175 {offsets = [0, 37], sizes = [6, 288], strides = [1, 1]} : vector<6x326xf32> to vector<6x288xf32>
    %212 = vector.extract_strided_slice %2 {offsets = [0, 7], sizes = [6, 1], strides = [1, 1]} : vector<6x27xf32> to vector<6x1xf32>
    %213 = vector.broadcast %212 : vector<6x1xf32> to vector<6x288xf32>
    %214 = arith.mulf %213, %211 : vector<6x288xf32>
    %215 = arith.addf %210, %214 : vector<6x288xf32>
    %216 = vector.extract_strided_slice %175 {offsets = [0, 38], sizes = [6, 288], strides = [1, 1]} : vector<6x326xf32> to vector<6x288xf32>
    %217 = vector.extract_strided_slice %2 {offsets = [0, 8], sizes = [6, 1], strides = [1, 1]} : vector<6x27xf32> to vector<6x1xf32>
    %218 = vector.broadcast %217 : vector<6x1xf32> to vector<6x288xf32>
    %219 = arith.mulf %218, %216 : vector<6x288xf32>
    %220 = arith.addf %215, %219 : vector<6x288xf32>
    %221 = vector.extract_strided_slice %165 {offsets = [1, 0], sizes = [1, 326], strides = [1, 1]} : vector<6x326xf32> to vector<1x326xf32>
    %222 = vector.shape_cast %221 : vector<1x326xf32> to vector<1x326xf32>
    %223 = vector.broadcast %222 : vector<1x326xf32> to vector<3x326xf32>
    %224 = vector.extract_strided_slice %165 {offsets = [4, 0], sizes = [1, 326], strides = [1, 1]} : vector<6x326xf32> to vector<1x326xf32>
    %225 = vector.shape_cast %224 : vector<1x326xf32> to vector<1x326xf32>
    %226 = vector.broadcast %225 : vector<1x326xf32> to vector<3x326xf32>
    %227 = tpu.concatenate %223, %226 in 0 : vector<3x326xf32>, vector<3x326xf32> -> vector<6x326xf32>
    %228 = vector.extract_strided_slice %227 {offsets = [0, 0], sizes = [6, 288], strides = [1, 1]} : vector<6x326xf32> to vector<6x288xf32>
    %229 = vector.extract_strided_slice %2 {offsets = [0, 9], sizes = [6, 1], strides = [1, 1]} : vector<6x27xf32> to vector<6x1xf32>
    %230 = vector.broadcast %229 : vector<6x1xf32> to vector<6x288xf32>
    %231 = arith.mulf %230, %228 : vector<6x288xf32>
    %232 = arith.addf %220, %231 : vector<6x288xf32>
    %233 = vector.extract_strided_slice %227 {offsets = [0, 1], sizes = [6, 288], strides = [1, 1]} : vector<6x326xf32> to vector<6x288xf32>
    %234 = vector.extract_strided_slice %2 {offsets = [0, 10], sizes = [6, 1], strides = [1, 1]} : vector<6x27xf32> to vector<6x1xf32>
    %235 = vector.broadcast %234 : vector<6x1xf32> to vector<6x288xf32>
    %236 = arith.mulf %235, %233 : vector<6x288xf32>
    %237 = arith.addf %232, %236 : vector<6x288xf32>
    %238 = vector.extract_strided_slice %227 {offsets = [0, 2], sizes = [6, 288], strides = [1, 1]} : vector<6x326xf32> to vector<6x288xf32>
    %239 = vector.extract_strided_slice %2 {offsets = [0, 11], sizes = [6, 1], strides = [1, 1]} : vector<6x27xf32> to vector<6x1xf32>
    %240 = vector.broadcast %239 : vector<6x1xf32> to vector<6x288xf32>
    %241 = arith.mulf %240, %238 : vector<6x288xf32>
    %242 = arith.addf %237, %241 : vector<6x288xf32>
    %243 = vector.extract_strided_slice %227 {offsets = [0, 18], sizes = [6, 288], strides = [1, 1]} : vector<6x326xf32> to vector<6x288xf32>
    %244 = vector.extract_strided_slice %2 {offsets = [0, 12], sizes = [6, 1], strides = [1, 1]} : vector<6x27xf32> to vector<6x1xf32>
    %245 = vector.broadcast %244 : vector<6x1xf32> to vector<6x288xf32>
    %246 = arith.mulf %245, %243 : vector<6x288xf32>
    %247 = arith.addf %242, %246 : vector<6x288xf32>
    %248 = vector.extract_strided_slice %227 {offsets = [0, 19], sizes = [6, 288], strides = [1, 1]} : vector<6x326xf32> to vector<6x288xf32>
    %249 = vector.extract_strided_slice %2 {offsets = [0, 13], sizes = [6, 1], strides = [1, 1]} : vector<6x27xf32> to vector<6x1xf32>
    %250 = vector.broadcast %249 : vector<6x1xf32> to vector<6x288xf32>
    %251 = arith.mulf %250, %248 : vector<6x288xf32>
    %252 = arith.addf %247, %251 : vector<6x288xf32>
    %253 = vector.extract_strided_slice %227 {offsets = [0, 20], sizes = [6, 288], strides = [1, 1]} : vector<6x326xf32> to vector<6x288xf32>
    %254 = vector.extract_strided_slice %2 {offsets = [0, 14], sizes = [6, 1], strides = [1, 1]} : vector<6x27xf32> to vector<6x1xf32>
    %255 = vector.broadcast %254 : vector<6x1xf32> to vector<6x288xf32>
    %256 = arith.mulf %255, %253 : vector<6x288xf32>
    %257 = arith.addf %252, %256 : vector<6x288xf32>
    %258 = vector.extract_strided_slice %227 {offsets = [0, 36], sizes = [6, 288], strides = [1, 1]} : vector<6x326xf32> to vector<6x288xf32>
    %259 = vector.extract_strided_slice %2 {offsets = [0, 15], sizes = [6, 1], strides = [1, 1]} : vector<6x27xf32> to vector<6x1xf32>
    %260 = vector.broadcast %259 : vector<6x1xf32> to vector<6x288xf32>
    %261 = arith.mulf %260, %258 : vector<6x288xf32>
    %262 = arith.addf %257, %261 : vector<6x288xf32>
    %263 = vector.extract_strided_slice %227 {offsets = [0, 37], sizes = [6, 288], strides = [1, 1]} : vector<6x326xf32> to vector<6x288xf32>
    %264 = vector.extract_strided_slice %2 {offsets = [0, 16], sizes = [6, 1], strides = [1, 1]} : vector<6x27xf32> to vector<6x1xf32>
    %265 = vector.broadcast %264 : vector<6x1xf32> to vector<6x288xf32>
    %266 = arith.mulf %265, %263 : vector<6x288xf32>
    %267 = arith.addf %262, %266 : vector<6x288xf32>
    %268 = vector.extract_strided_slice %227 {offsets = [0, 38], sizes = [6, 288], strides = [1, 1]} : vector<6x326xf32> to vector<6x288xf32>
    %269 = vector.extract_strided_slice %2 {offsets = [0, 17], sizes = [6, 1], strides = [1, 1]} : vector<6x27xf32> to vector<6x1xf32>
    %270 = vector.broadcast %269 : vector<6x1xf32> to vector<6x288xf32>
    %271 = arith.mulf %270, %268 : vector<6x288xf32>
    %272 = arith.addf %267, %271 : vector<6x288xf32>
    %273 = vector.extract_strided_slice %165 {offsets = [2, 0], sizes = [1, 326], strides = [1, 1]} : vector<6x326xf32> to vector<1x326xf32>
    %274 = vector.shape_cast %273 : vector<1x326xf32> to vector<1x326xf32>
    %275 = vector.broadcast %274 : vector<1x326xf32> to vector<3x326xf32>
    %276 = vector.extract_strided_slice %165 {offsets = [5, 0], sizes = [1, 326], strides = [1, 1]} : vector<6x326xf32> to vector<1x326xf32>
    %277 = vector.shape_cast %276 : vector<1x326xf32> to vector<1x326xf32>
    %278 = vector.broadcast %277 : vector<1x326xf32> to vector<3x326xf32>
    %279 = tpu.concatenate %275, %278 in 0 : vector<3x326xf32>, vector<3x326xf32> -> vector<6x326xf32>
    %280 = vector.extract_strided_slice %279 {offsets = [0, 0], sizes = [6, 288], strides = [1, 1]} : vector<6x326xf32> to vector<6x288xf32>
    %281 = vector.extract_strided_slice %2 {offsets = [0, 18], sizes = [6, 1], strides = [1, 1]} : vector<6x27xf32> to vector<6x1xf32>
    %282 = vector.broadcast %281 : vector<6x1xf32> to vector<6x288xf32>
    %283 = arith.mulf %282, %280 : vector<6x288xf32>
    %284 = arith.addf %272, %283 : vector<6x288xf32>
    %285 = vector.extract_strided_slice %279 {offsets = [0, 1], sizes = [6, 288], strides = [1, 1]} : vector<6x326xf32> to vector<6x288xf32>
    %286 = vector.extract_strided_slice %2 {offsets = [0, 19], sizes = [6, 1], strides = [1, 1]} : vector<6x27xf32> to vector<6x1xf32>
    %287 = vector.broadcast %286 : vector<6x1xf32> to vector<6x288xf32>
    %288 = arith.mulf %287, %285 : vector<6x288xf32>
    %289 = arith.addf %284, %288 : vector<6x288xf32>
    %290 = vector.extract_strided_slice %279 {offsets = [0, 2], sizes = [6, 288], strides = [1, 1]} : vector<6x326xf32> to vector<6x288xf32>
    %291 = vector.extract_strided_slice %2 {offsets = [0, 20], sizes = [6, 1], strides = [1, 1]} : vector<6x27xf32> to vector<6x1xf32>
    %292 = vector.broadcast %291 : vector<6x1xf32> to vector<6x288xf32>
    %293 = arith.mulf %292, %290 : vector<6x288xf32>
    %294 = arith.addf %289, %293 : vector<6x288xf32>
    %295 = vector.extract_strided_slice %279 {offsets = [0, 18], sizes = [6, 288], strides = [1, 1]} : vector<6x326xf32> to vector<6x288xf32>
    %296 = vector.extract_strided_slice %2 {offsets = [0, 21], sizes = [6, 1], strides = [1, 1]} : vector<6x27xf32> to vector<6x1xf32>
    %297 = vector.broadcast %296 : vector<6x1xf32> to vector<6x288xf32>
    %298 = arith.mulf %297, %295 : vector<6x288xf32>
    %299 = arith.addf %294, %298 : vector<6x288xf32>
    %300 = vector.extract_strided_slice %279 {offsets = [0, 19], sizes = [6, 288], strides = [1, 1]} : vector<6x326xf32> to vector<6x288xf32>
    %301 = vector.extract_strided_slice %2 {offsets = [0, 22], sizes = [6, 1], strides = [1, 1]} : vector<6x27xf32> to vector<6x1xf32>
    %302 = vector.broadcast %301 : vector<6x1xf32> to vector<6x288xf32>
    %303 = arith.mulf %302, %300 : vector<6x288xf32>
    %304 = arith.addf %299, %303 : vector<6x288xf32>
    %305 = vector.extract_strided_slice %279 {offsets = [0, 20], sizes = [6, 288], strides = [1, 1]} : vector<6x326xf32> to vector<6x288xf32>
    %306 = vector.extract_strided_slice %2 {offsets = [0, 23], sizes = [6, 1], strides = [1, 1]} : vector<6x27xf32> to vector<6x1xf32>
    %307 = vector.broadcast %306 : vector<6x1xf32> to vector<6x288xf32>
    %308 = arith.mulf %307, %305 : vector<6x288xf32>
    %309 = arith.addf %304, %308 : vector<6x288xf32>
    %310 = vector.extract_strided_slice %279 {offsets = [0, 36], sizes = [6, 288], strides = [1, 1]} : vector<6x326xf32> to vector<6x288xf32>
    %311 = vector.extract_strided_slice %2 {offsets = [0, 24], sizes = [6, 1], strides = [1, 1]} : vector<6x27xf32> to vector<6x1xf32>
    %312 = vector.broadcast %311 : vector<6x1xf32> to vector<6x288xf32>
    %313 = arith.mulf %312, %310 : vector<6x288xf32>
    %314 = arith.addf %309, %313 : vector<6x288xf32>
    %315 = vector.extract_strided_slice %279 {offsets = [0, 37], sizes = [6, 288], strides = [1, 1]} : vector<6x326xf32> to vector<6x288xf32>
    %316 = vector.extract_strided_slice %2 {offsets = [0, 25], sizes = [6, 1], strides = [1, 1]} : vector<6x27xf32> to vector<6x1xf32>
    %317 = vector.broadcast %316 : vector<6x1xf32> to vector<6x288xf32>
    %318 = arith.mulf %317, %315 : vector<6x288xf32>
    %319 = arith.addf %314, %318 : vector<6x288xf32>
    %320 = vector.extract_strided_slice %279 {offsets = [0, 38], sizes = [6, 288], strides = [1, 1]} : vector<6x326xf32> to vector<6x288xf32>
    %321 = vector.extract_strided_slice %2 {offsets = [0, 26], sizes = [6, 1], strides = [1, 1]} : vector<6x27xf32> to vector<6x1xf32>
    %322 = vector.broadcast %321 : vector<6x1xf32> to vector<6x288xf32>
    %323 = arith.mulf %322, %320 : vector<6x288xf32>
    %324 = arith.addf %319, %323 : vector<6x288xf32>
    %325 = vector.extract_strided_slice %0 {offsets = [0, 55], sizes = [6, 288], strides = [1, 1]} : vector<6x396xf32> to vector<6x288xf32>
    %cst_11 = arith.constant 0.000000e+00 : f32
    %326 = vector.broadcast %cst_11 : f32 to vector<6x288xf32>
    %327 = arith.maximumf %324, %326 : vector<6x288xf32>
    %328 = arith.addf %327, %325 : vector<6x288xf32>
    %c0_12 = arith.constant 0 : index
    %c0_13 = arith.constant 0 : index
    %329 = vector.load %arg6[%c0_12, %c0_13] : memref<6x288xf32, #tpu.memory_space<vmem>>, vector<6x288xf32>
    tpu.vector_store %arg6[%c0_12, %c0_13], %328 {strides = array<i32>} : memref<6x288xf32, #tpu.memory_space<vmem>>, vector<6x288xf32>,
    return
  }
}

</mosaic_0001>

<bundles_post_ra>
// kernel: tpu_custom_call.1
= control target key start
LH: loop header
LB: loop body
LE: loop exit
PB: predicated region body
PF: predicated region fallthrough
CT: control target
= control target key end

     0   :  { %11 = vsyncpa [#allocation3], 0  ;;  %s2788_s0 = inlined_call_operand.hbm [shape: f32[6,396], index: 0, kind: input, shape index: {}]   ;;  %s2789_s1 = inlined_call_operand.vmem [shape: f32[6,27], index: 1, kind: input, shape index: {}]   ;;  %s2790_s2 = inlined_call_operand.vmem [shape: f32[6,1], index: 2, kind: input, shape index: {}]   ;;  %s2791_s3 = inlined_call_operand.hbm [shape: f32[6,27], index: 3, kind: input, shape index: {}]   ;;  %s2792_s4 = inlined_call_operand.vmem [shape: f32[6,1], index: 4, kind: input, shape index: {}]   ;;  %s2793_s5 = inlined_call_operand.vmem [shape: f32[6,326], index: 5, kind: input, shape index: {}]   ;;  %s2794_s6 = inlined_call_operand.hbm [shape: f32[6,288], index: 6, kind: output, shape index: {}]  }
   0x1   :  { %12 = vsyncpa [#allocation6], 0 }
   0x2   :  { %13 = vsyncpa [#allocation4], 0  ;;  %s1699_s21 = smov [#allocation2]   ;;  %s1700_s23 = smov [#allocation5]  }
   0x3   :  { %s20_s22 = sshll.u32 %s1699_s21, 4  ;;  %s34_s24 = sshll.u32 %s1700_s23, 4  ;;  %s21_s22 = int_to_ptr.vmem [resolvable:$true] %s20_s22  ;;  %s35_s24 = int_to_ptr.vmem [resolvable:$true] %s34_s24 }
   0x4   :  { %s1627_s27 = scalar_lea.hbm %s2788_s0, 512 }
   0x5   :  { %p1628_p0 = scmp.ne.s32.totalorder %s2788_s0, %s1627_s27  ;;  %p1631_p1 = scmp.lt.u32.totalorder %s1627_s27, %s2788_s0 }
   0x7   :  { %p1633_p2 = pnand %p1631_p1, %p1628_p0 }
   0x9   :  { %1636 = shalt.err (!%p1633_p2)
}
   0xa   :  { %s1637_s8 = scalar_lea.vmem %s21_s22, 512  ;;  %p1642_p4 = scmp.lt.s32.totalorder %s21_s22, %s21_s22 }
   0xb   :  { %p1638_p3 = scmp.ne.s32.totalorder %s21_s22, %s1637_s8  ;;  %p1643_p5 = scmp.lt.s32.totalorder %s1637_s8, %s1637_s8 }
   0xd   :  { %p1644_p6 = por %p1643_p5, %p1642_p4 }
   0xf   :  { %p1645_p7 = pnand %p1644_p6, %p1638_p3 }
  0x11   :  { %1648 = shalt.err (!%p1645_p7)
}
  0x12   :  { %23 = dma.hbm_to_vmem [thread:$0]  %s2788_s0, 512, %s21_s22, [#allocation3]  }
  0x13   :  { %s1649_s13 = scalar_lea.hbm %s2791_s3, 128 }
  0x14   :  { %p1650_p8 = scmp.ne.s32.totalorder %s2791_s3, %s1649_s13  ;;  %p1653_p9 = scmp.lt.u32.totalorder %s1649_s13, %s2791_s3 }
  0x16   :  { %p1655_p10 = pnand %p1653_p9, %p1650_p8 }
  0x18   :  { %1658 = shalt.err (!%p1655_p10)
}
  0x19   :  { %s1659_s18 = scalar_lea.vmem %s35_s24, 128  ;;  %p1664_p12 = scmp.lt.s32.totalorder %s35_s24, %s35_s24 }
  0x1a   :  { %p1660_p11 = scmp.ne.s32.totalorder %s35_s24, %s1659_s18  ;;  %p1665_p13 = scmp.lt.s32.totalorder %s1659_s18, %s1659_s18 }
  0x1c   :  { %p1666_p0 = por %p1665_p13, %p1664_p12 }
  0x1e   :  { %p1667_p1 = pnand %p1666_p0, %p1660_p11 }
  0x20   :  { %1670 = shalt.err (!%p1667_p1)
}
  0x21   :  { %37 = dma.hbm_to_vmem [thread:$0]  %s2791_s3, 128, %s35_s24, [#allocation6]  }
  0x22   :  { %1693 = dma.done.wait [#allocation3], 512  }
  0x23   :  { %1694 = vsyncadd [#allocation3], 4294966784 }
  0x24   :  { %1695 = dma.done.wait [#allocation6], 128  }
  0x25   :  { %1696 = vsyncadd [#allocation6], 4294967168  ;;  %v2814_v0 = vmov 1   ;;  %v2815_v1 = vmov 2   ;;  %v1803_v2 = vld [vmem:[%s2789_s1] sm:$0x3f]  ;;  %v62_v19 = vlaneseq }
  0x26   :  { %1569 = vset.pattern.permute.xlu1 %v2814_v0  ;;  %1570 = vset.pattern.permute.xlu0 %v2815_v1  ;;  %v2812_v3 = vmov 3   ;;  %v2803_v4 = vmov 10   ;;  %v2813_v5 = vmov 4   ;;  %v2810_v6 = vmov 5   ;;  %v1848_v24 = vld [vmem:[#allocation2 + $0x8] sm:$0x3f] }
  0x27   :  { %102 = vperm.xlu1 %1569, %v1803_v2   ;;  %127 = vperm.xlu0 %1570, %v1803_v2   ;;  %v2807_v7 = vmov 6   ;;  %v2811_v8 = vmov 7   ;;  %v2805_v9 = vmov 8   ;;  %v2795_v10 = vmov 9   ;;  %v1850_v25 = vld [vmem:[#allocation2] sm:$0x3f] }
  0x28   :  { %v2809_v11 = vmov 11   ;;  %v2802_v12 = vmov 12   ;;  %v2801_v13 = vmov 13   ;;  %v2806_v14 = vmov 14   ;;  %v1860_v30 = vld [vmem:[#allocation2 + $0x10] sm:$0x3f] }
  0x29   :  { %v2800_v15 = vmov 15   ;;  %v2798_v16 = vmov 16   ;;  %v2804_v17 = vmov 17   ;;  %v2799_v18 = vmov 18   ;;  %s1720_s1 = smov 127   ;;  %s1721_s3 = smov 126  }
  0x2a   :  { %v1839_v20 = vshrl.u32 %v62_v19, 7  ;;  %v2797_v23 = vmov 19   ;;  %vm86_vm0 = vcmask 1042432   ;;  %s1722_s22 = smov 110   ;;  %s1723_s23 = smov 109   ;;  %vm117_vm1 = vcmask 1039360  }
  0x2b   :  { %1571 = vset.pattern.permute.xlu1 %v2812_v3  ;;  %1578 = vset.pattern.permute.xlu0 %v2803_v4  ;;  %s1724_s24 = smov 108   ;;  %s1725_s25 = smov 92   ;;  %vm142_vm2 = vcmask 1031168   ;;  %vm167_vm3 = vcmask 900096   ;;  %vm192_vm4 = vcmask 891904   ;;  %vm217_vm5 = vcmask 883712  }
  0x2c   :  { %152 = vperm.xlu1 %1571, %v1803_v2   ;;  %339 = vperm.xlu0 %1578, %v1803_v2   ;;  %v1842_v21 = vsub.s32 0, %v1839_v20  ;;  %v1845_v22 = vsub.s32 3, %v1839_v20  ;;  %v1905_v58 = vsub.s32 1, %v1839_v20  ;;  %v1908_v59 = vsub.s32 4, %v1839_v20  ;;  %s1726_s26 = smov 91   ;;  %s1727_s27 = smov 90  }
  0x2d   :  { %s1736_s7 = smov 17   ;;  %vm242_vm6 = vcmask 752640   ;;  %vm267_vm7 = vcmask 744448   ;;  %vm292_vm8 = vcmask 736256   ;;  %vm771_vm9 = vcmask 138240  }
  0x2e   :  { %2846 = vst [vmem:[#allocation11_spill] sm:$0xff] %v1842_v21  ;;  %2847 = vst [vmem:[#allocation12_spill] sm:$0xff] %v1845_v22  ;;  %v69_v26 = vrot.slane %v1848_v24, %v1842_v21  ;;  %v81_v27 = vrot.slane %v1848_v24, %v1845_v22  ;;  %v65_v28 = vrot.slane %v1850_v25, %v1842_v21  ;;  %vm1503_vm10 = vcmask 908288  }
  0x2f   :  { %v77_v29 = vrot.slane %v1850_v25, %v1845_v22  ;;  %v73_v33 = vrot.slane %v1860_v30, %v1842_v21  ;;  %v85_v34 = vrot.slane %v1860_v30, %v1845_v22  ;;  %2848 = vst [vmem:[#allocation13_spill] sm:$0xff] %v1905_v58  ;;  %2849 = vst [vmem:[#allocation14_spill] sm:$0xff] %v1908_v59  ;;  %vm1511_vm11 = vcmask 259072  }
  0x30   :  { %1572 = vset.pattern.permute.xlu1 %v2813_v5  ;;  %1587 = vset.pattern.permute.xlu0 %v2797_v23  ;;  %v1863_v31 = vsel %vm86_vm0, %v69_v26, %v81_v27  ;;  %v304_v19 = vrot.slane %v1850_v25, %v1905_v58  ;;  %v316_v26 = vrot.slane %v1850_v25, %v1908_v59 }
  0x31   :  { %177 = vperm.xlu1 %1572, %v1803_v2   ;;  %v1866_v32 = vsel %vm86_vm0, %v65_v28, %v77_v29  ;;  %v1875_v39 = vsel %vm86_vm0, %v73_v33, %v85_v34  ;;  %v308_v29 = vrot.slane %v1848_v24, %v1905_v58  ;;  %v320_v33 = vrot.slane %v1848_v24, %v1908_v59 }
  0x32   :  { %v1927_v34 = vsel %vm86_vm0, %v304_v19, %v316_v26 }
  0x35   :  { %1573 = vset.pattern.permute.xlu1 %v2810_v6 }
  0x36   :  { %202 = vperm.xlu1 %1573, %v1803_v2  }
  0x3a   :  { %1574 = vset.pattern.permute.xlu1 %v2807_v7 }
  0x3b   :  { %227 = vperm.xlu1 %1574, %v1803_v2  }
  0x3f   :  { %1575 = vset.pattern.permute.xlu1 %v2811_v8 }
  0x40   :  { %252 = vperm.xlu1 %1575, %v1803_v2  }
  0x44   :  { %1576 = vset.pattern.permute.xlu1 %v2805_v9 }
  0x45   :  { %277 = vperm.xlu1 %1576, %v1803_v2  }
  0x49   :  { %1577 = vset.pattern.permute.xlu1 %v2795_v10  ;;  %v2060_v10 = vsub.s32 5, %v1839_v20 }
  0x4a   :  { %329 = vperm.xlu1 %1577, %v1803_v2  }
  0x4b   :  { %2853 = vst [vmem:[#allocation18_spill] sm:$0xff] %v2060_v10 }
  0x4e   :  { %1579 = vset.pattern.permute.xlu1 %v2809_v11 }
  0x4f   :  { %363 = vperm.xlu1 %1579, %v1803_v2  }
  0x53   :  { %1580 = vset.pattern.permute.xlu1 %v2802_v12  ;;  %v549_v12 = vrot.slane %v1848_v24, %v2060_v10 }
  0x54   :  { %387 = vperm.xlu1 %1580, %v1803_v2  }
  0x58   :  { %1581 = vset.pattern.permute.xlu1 %v2801_v13 }
  0x59   :  { %411 = vperm.xlu1 %1581, %v1803_v2  }
  0x5d   :  { %1582 = vset.pattern.permute.xlu1 %v2806_v14 }
  0x5e   :  { %435 = vperm.xlu1 %1582, %v1803_v2  }
  0x62   :  { %1583 = vset.pattern.permute.xlu1 %v2800_v15  ;;  %v553_v15 = vrot.slane %v1860_v30, %v2060_v10 }
  0x63   :  { %459 = vperm.xlu1 %1583, %v1803_v2  }
  0x67   :  { %1584 = vset.pattern.permute.xlu1 %v2798_v16 }
  0x68   :  { %483 = vperm.xlu1 %1584, %v1803_v2  }
  0x6c   :  { %1585 = vset.pattern.permute.xlu1 %v2804_v17 }
  0x6d   :  { %507 = vperm.xlu1 %1585, %v1803_v2  }
  0x71   :  { %1586 = vset.pattern.permute.xlu1 %v2799_v18  ;;  %v545_v18 = vrot.slane %v1850_v25, %v2060_v10 }
  0x72   :  { %558 = vperm.xlu1 %1586, %v1803_v2  }
  0xa6   :  { %v103_v35 = vpop.permute.xlu1 %102  ;;  %v128_v36 = vpop.permute.xlu0 %127 }
  0xa7   :  { %v106_v37 = vmul.f32 %v103_v35, %v1863_v31  ;;  %v105_v38 = vmul.f32 %v103_v35, %v1866_v32  ;;  %v132_v40 = vmul.f32 %v128_v36, %v1875_v39  ;;  %v107_v41 = vmul.f32 %v103_v35, %v1875_v39 }
  0xa8   :  { %v130_v44 = vmul.f32 %v128_v36, %v1866_v32  ;;  %v131_v47 = vmul.f32 %v128_v36, %v1863_v31 }
  0xa9   :  { %113 = vrot.lane.b32.xlu0 %v106_v37, %s1720_s1  ;;  %111 = vrot.lane.b32.xlu1 %v105_v38, %s1720_s1 }
  0xab   :  { %v153_v42 = vpop.permute.xlu1 %152  ;;  %v340_v28 = vpop.permute.xlu0 %339 }
  0xac   :  { %v155_v43 = vmul.f32 %v153_v42, %v1866_v32  ;;  %v157_v46 = vmul.f32 %v153_v42, %v1875_v39  ;;  %v156_v49 = vmul.f32 %v153_v42, %v1863_v31  ;;  %v342_v38 = vmul.f32 %v340_v28, %v1927_v34 }
  0xad   :  { %140 = vrot.lane.b32.xlu0 %v132_v40, %s1721_s3  ;;  %115 = vrot.lane.b32.xlu1 %v107_v41, %s1720_s1  ;;  %v1937_v40 = vsel %vm86_vm0, %v308_v29, %v320_v33 }
  0xae   :  { %v343_v41 = vmul.f32 %v340_v28, %v1937_v40 }
  0xb0   :  { %v178_v45 = vpop.permute.xlu1 %177 }
  0xb1   :  { %161 = vrot.lane.b32.xlu0 %v155_v43, %s1722_s22  ;;  %136 = vrot.lane.b32.xlu1 %v130_v44, %s1721_s3  ;;  %v180_v48 = vmul.f32 %v178_v45, %v1866_v32  ;;  %v182_v51 = vmul.f32 %v178_v45, %v1875_v39  ;;  %v181_v52 = vmul.f32 %v178_v45, %v1863_v31 }
  0xb5   :  { %165 = vrot.lane.b32.xlu0 %v157_v46, %s1722_s22  ;;  %138 = vrot.lane.b32.xlu1 %v131_v47, %s1721_s3  ;;  %v203_v50 = vpop.permute.xlu1 %202  ;;  %v312_v46 = vrot.slane %v1860_v30, %v1905_v58  ;;  %v324_v47 = vrot.slane %v1860_v30, %v1908_v59 }
  0xb6   :  { %v205_v53 = vmul.f32 %v203_v50, %v1866_v32  ;;  %v206_v54 = vmul.f32 %v203_v50, %v1863_v31  ;;  %v207_v60 = vmul.f32 %v203_v50, %v1875_v39 }
  0xb7   :  { %v1955_v50 = vsel %vm86_vm0, %v312_v46, %v324_v47 }
  0xb9   :  { %186 = vrot.lane.b32.xlu0 %v180_v48, %s1723_s23  ;;  %163 = vrot.lane.b32.xlu1 %v156_v49, %s1722_s22 }
  0xba   :  { %v228_v55 = vpop.permute.xlu1 %227 }
  0xbb   :  { %v231_v56 = vmul.f32 %v228_v55, %v1863_v31  ;;  %v230_v61 = vmul.f32 %v228_v55, %v1866_v32  ;;  %v232_v35 = vmul.f32 %v228_v55, %v1875_v39 }
  0xbd   :  { %190 = vrot.lane.b32.xlu0 %v182_v51, %s1723_s23  ;;  %188 = vrot.lane.b32.xlu1 %v181_v52, %s1723_s23 }
  0xbf   :  { %v253_v57 = vpop.permute.xlu1 %252 }
  0xc0   :  { %v256_v62 = vmul.f32 %v253_v57, %v1863_v31  ;;  %v255_v37 = vmul.f32 %v253_v57, %v1866_v32  ;;  %v257_v43 = vmul.f32 %v253_v57, %v1875_v39 }
  0xc1   :  { %211 = vrot.lane.b32.xlu0 %v205_v53, %s1724_s24  ;;  %213 = vrot.lane.b32.xlu1 %v206_v54, %s1724_s24  ;;  %v344_v53 = vmul.f32 %v340_v28, %v1955_v50 }
  0xc4   :  { %v278_v63 = vpop.permute.xlu1 %277 }
  0xc5   :  { %215 = vrot.lane.b32.xlu0 %v207_v60, %s1724_s24  ;;  %238 = vrot.lane.b32.xlu1 %v231_v56, %s1725_s25  ;;  %v281_v27 = vmul.f32 %v278_v63, %v1863_v31  ;;  %v280_v44 = vmul.f32 %v278_v63, %v1866_v32  ;;  %v282_v52 = vmul.f32 %v278_v63, %v1875_v39 }
  0xc9   :  { %236 = vrot.lane.b32.xlu0 %v230_v61, %s1725_s25  ;;  %263 = vrot.lane.b32.xlu1 %v256_v62, %s1726_s26  ;;  %v1930_v36 = vpop.permute.xlu1 %329 }
  0xcd   :  { %240 = vrot.lane.b32.xlu0 %v232_v35, %s1725_s25  ;;  %288 = vrot.lane.b32.xlu1 %v281_v27, %s1727_s27 }
  0xce   :  { %v364_v42 = vpop.permute.xlu1 %363 }
  0xcf   :  { %v367_v45 = vmul.f32 %v364_v42, %v1937_v40  ;;  %v366_v56 = vmul.f32 %v364_v42, %v1927_v34  ;;  %v368_v62 = vmul.f32 %v364_v42, %v1955_v50 }
  0xd1   :  { %261 = vrot.lane.b32.xlu0 %v255_v37, %s1726_s26  ;;  %348 = vrot.lane.b32.xlu1 %v342_v38, %s1720_s1 }
  0xd3   :  { %v388_v48 = vpop.permute.xlu1 %387 }
  0xd4   :  { %v391_v49 = vmul.f32 %v388_v48, %v1937_v40  ;;  %v390_v19 = vmul.f32 %v388_v48, %v1927_v34  ;;  %v392_v29 = vmul.f32 %v388_v48, %v1955_v50 }
  0xd5   :  { %265 = vrot.lane.b32.xlu0 %v257_v43, %s1726_s26  ;;  %350 = vrot.lane.b32.xlu1 %v343_v41, %s1720_s1 }
  0xd8   :  { %v412_v51 = vpop.permute.xlu1 %411 }
  0xd9   :  { %286 = vrot.lane.b32.xlu0 %v280_v44, %s1727_s27  ;;  %374 = vrot.lane.b32.xlu1 %v367_v45, %s1721_s3  ;;  %v415_v54 = vmul.f32 %v412_v51, %v1937_v40  ;;  %v414_v33 = vmul.f32 %v412_v51, %v1927_v34  ;;  %v416_v35 = vmul.f32 %v412_v51, %v1955_v50  ;;  %v2796_v51 = vmov 20  }
  0xda   :  { %1588 = vset.pattern.permute.xlu1 %v2796_v51 }
  0xdd   :  { %290 = vrot.lane.b32.xlu0 %v282_v52, %s1727_s27  ;;  %398 = vrot.lane.b32.xlu1 %v391_v49, %s1722_s22  ;;  %v436_v55 = vpop.permute.xlu1 %435 }
  0xde   :  { %v439_v57 = vmul.f32 %v436_v55, %v1937_v40  ;;  %v438_v37 = vmul.f32 %v436_v55, %v1927_v34  ;;  %v440_v38 = vmul.f32 %v436_v55, %v1955_v50 }
  0xe1   :  { %352 = vrot.lane.b32.xlu0 %v344_v53, %s1720_s1  ;;  %422 = vrot.lane.b32.xlu1 %v415_v54, %s1723_s23 }
  0xe2   :  { %v460_v60 = vpop.permute.xlu1 %459 }
  0xe3   :  { %v463_v61 = vmul.f32 %v460_v60, %v1937_v40  ;;  %v462_v41 = vmul.f32 %v460_v60, %v1927_v34  ;;  %v464_v42 = vmul.f32 %v460_v60, %v1955_v50 }
  0xe5   :  { %372 = vrot.lane.b32.xlu0 %v366_v56, %s1721_s3  ;;  %446 = vrot.lane.b32.xlu1 %v439_v57, %s1724_s24 }
  0xe7   :  { %v484_v63 = vpop.permute.xlu1 %483 }
  0xe8   :  { %v487_v26 = vmul.f32 %v484_v63, %v1937_v40  ;;  %v486_v43 = vmul.f32 %v484_v63, %v1927_v34  ;;  %v488_v44 = vmul.f32 %v484_v63, %v1955_v50 }
  0xe9   :  { %376 = vrot.lane.b32.xlu0 %v368_v62, %s1721_s3  ;;  %470 = vrot.lane.b32.xlu1 %v463_v61, %s1725_s25 }
  0xec   :  { %v508_v27 = vpop.permute.xlu1 %507 }
  0xed   :  { %396 = vrot.lane.b32.xlu0 %v390_v19, %s1722_s22  ;;  %494 = vrot.lane.b32.xlu1 %v487_v26, %s1726_s26  ;;  %v511_v28 = vmul.f32 %v508_v27, %v1937_v40  ;;  %v510_v45 = vmul.f32 %v508_v27, %v1927_v34  ;;  %v512_v46 = vmul.f32 %v508_v27, %v1955_v50 }
  0xf1   :  { %400 = vrot.lane.b32.xlu0 %v392_v29, %s1722_s22  ;;  %518 = vrot.lane.b32.xlu1 %v511_v28, %s1727_s27 }
  0xf5   :  { %420 = vrot.lane.b32.xlu0 %v414_v33, %s1723_s23 }
  0xf9   :  { %424 = vrot.lane.b32.xlu0 %v416_v35, %s1723_s23 }
  0xfd   :  { %444 = vrot.lane.b32.xlu0 %v438_v37, %s1724_s24 }
 0x101   :  { %448 = vrot.lane.b32.xlu0 %v440_v38, %s1724_s24 }
 0x105   :  { %468 = vrot.lane.b32.xlu0 %v462_v41, %s1725_s25 }
 0x109   :  { %472 = vrot.lane.b32.xlu0 %v464_v42, %s1725_s25 }
 0x10d   :  { %492 = vrot.lane.b32.xlu0 %v486_v43, %s1726_s26 }
 0x111   :  { %496 = vrot.lane.b32.xlu0 %v488_v44, %s1726_s26 }
 0x115   :  { %516 = vrot.lane.b32.xlu0 %v510_v45, %s1727_s27 }
 0x119   :  { %520 = vrot.lane.b32.xlu0 %v512_v46, %s1727_s27  ;;  %v2057_v46 = vsub.s32 2, %v1839_v20 }
 0x11b   :  { %v2000_v47 = vpop.permute.xlu0 %113  ;;  %2852 = vst [vmem:[#allocation17_spill] sm:$0xff] %v2057_v46  ;;  %v533_v23 = vrot.slane %v1850_v25, %v2057_v46  ;;  %v541_v16 = vrot.slane %v1860_v30, %v2057_v46  ;;  %v537_v20 = vrot.slane %v1848_v24, %v2057_v46 }
 0x11d   :  { %568 = vperm.xlu0 %1587, %v1803_v2   ;;  %v2079_v4 = vsel %vm86_vm0, %v533_v23, %v545_v18  ;;  %v2082_v17 = vsel %vm86_vm0, %v541_v16, %v553_v15  ;;  %v2087_v30 = vsel %vm86_vm0, %v537_v20, %v549_v12  ;;  %v2808_v15 = vmov 21   ;;  %v2095_v16 = vpop.permute.xlu1 %558 }
 0x11e   :  { %2856 = vst [vmem:[#allocation21_spill] sm:$0xff] %v2082_v17  ;;  %2857 = vst [vmem:[#allocation22_spill] sm:$0xff] %v2087_v30 }
 0x11f   :  { %v2003_v48 = vpop.permute.xlu0 %140  ;;  %2858 = vst [vmem:[#allocation23_spill] sm:$0xff] %v2095_v16 }
 0x121   :  { %v2097_v18 = vpop.permute.xlu1 %111 }
 0x123   :  { %v2005_v49 = vpop.permute.xlu0 %161 }
 0x125   :  { %v2099_v23 = vpop.permute.xlu1 %115 }
 0x127   :  { %v2008_v52 = vpop.permute.xlu0 %165 }
 0x129   :  { %v2101_v12 = vpop.permute.xlu1 %136 }
 0x12b   :  { %v2010_v53 = vpop.permute.xlu0 %186 }
 0x12d   :  { %v2103_v20 = vpop.permute.xlu1 %138 }
 0x12f   :  { %v2012_v54 = vpop.permute.xlu0 %190 }
 0x133   :  { %v2014_v55 = vpop.permute.xlu0 %211 }
 0x137   :  { %v2016_v56 = vpop.permute.xlu0 %215 }
 0x13b   :  { %v2018_v57 = vpop.permute.xlu0 %236 }
 0x13f   :  { %v2020_v60 = vpop.permute.xlu0 %240 }
 0x143   :  { %v2022_v61 = vpop.permute.xlu0 %261 }
 0x147   :  { %v2024_v62 = vpop.permute.xlu0 %265 }
 0x14b   :  { %v2026_v63 = vpop.permute.xlu0 %286 }
 0x14f   :  { %v2028_v19 = vpop.permute.xlu0 %290 }
 0x153   :  { %v2030_v26 = vpop.permute.xlu0 %352 }
 0x157   :  { %v2032_v27 = vpop.permute.xlu0 %372 }
 0x15b   :  { %v2034_v28 = vpop.permute.xlu0 %376 }
 0x15f   :  { %v2036_v29 = vpop.permute.xlu0 %396 }
 0x163   :  { %v2038_v33 = vpop.permute.xlu0 %400 }
 0x167   :  { %v2040_v35 = vpop.permute.xlu0 %420 }
 0x16b   :  { %v2042_v37 = vpop.permute.xlu0 %424 }
 0x16f   :  { %v2044_v38 = vpop.permute.xlu0 %444 }
 0x173   :  { %v2046_v41 = vpop.permute.xlu0 %448 }
 0x177   :  { %v2048_v42 = vpop.permute.xlu0 %468 }
 0x17b   :  { %v2050_v43 = vpop.permute.xlu0 %472 }
 0x17f   :  { %v2052_v44 = vpop.permute.xlu0 %492 }
 0x180   :  { %2850 = vst [vmem:[#allocation15_spill] sm:$0xff] %v2052_v44 }
 0x183   :  { %v2054_v45 = vpop.permute.xlu0 %496 }
 0x184   :  { %2851 = vst [vmem:[#allocation16_spill] sm:$0xff] %v2054_v45 }
 0x187   :  { %v2062_v51 = vpop.permute.xlu0 %516 }
 0x188   :  { %2854 = vst [vmem:[#allocation19_spill] sm:$0xff] %v2062_v51  ;;  %v2833_v51 = vmov 22  }
 0x18b   :  { %v2072_v13 = vpop.permute.xlu0 %520 }
 0x18c   :  { %2855 = vst [vmem:[#allocation20_spill] sm:$0xff] %v2072_v13 }
 0x19c   :  { %v569_v9 = vpop.permute.xlu0 %568 }
 0x19d   :  { %v573_v25 = vmul.f32 %v569_v9, %v2082_v17  ;;  %v571_v14 = vmul.f32 %v569_v9, %v2079_v4  ;;  %v572_v24 = vmul.f32 %v569_v9, %v2087_v30 }
 0x19f   :  { %581 = vrot.lane.b32.xlu0 %v573_v25, %s1720_s1  ;;  %577 = vrot.lane.b32.xlu1 %v571_v14, %s1720_s1  ;;  %v2105_v14 = vpop.permute.xlu1 %163 }
 0x1a3   :  { %579 = vrot.lane.b32.xlu1 %v572_v24, %s1720_s1  ;;  %v2107_v9 = vpop.permute.xlu1 %188 }
 0x1a7   :  { %592 = vperm.xlu1 %1588, %v1803_v2   ;;  %v2109_v25 = vpop.permute.xlu1 %213 }
 0x1ab   :  { %1589 = vset.pattern.permute.xlu1 %v2808_v15  ;;  %v2111_v24 = vpop.permute.xlu1 %238 }
 0x1af   :  { %v2113_v7 = vpop.permute.xlu1 %263 }
 0x1b3   :  { %v2115_v15 = vpop.permute.xlu1 %288 }
 0x1b7   :  { %v2117_v11 = vpop.permute.xlu1 %348 }
 0x1bb   :  { %v2119_v6 = vpop.permute.xlu1 %350 }
 0x1bf   :  { %v2121_v8 = vpop.permute.xlu1 %374 }
 0x1c3   :  { %v2123_v3 = vpop.permute.xlu1 %398 }
 0x1c7   :  { %v2125_v5 = vpop.permute.xlu1 %422 }
 0x1cb   :  { %v2127_v0 = vpop.permute.xlu1 %446 }
 0x1cf   :  { %v2129_v1 = vpop.permute.xlu1 %470 }
 0x1d3   :  { %v2131_v10 = vpop.permute.xlu1 %494 }
 0x1d7   :  { %v2133_v46 = vpop.permute.xlu1 %518 }
 0x1d8   :  { %2859 = vst [vmem:[#allocation24_spill] sm:$0xff] %v2133_v46 }
 0x211   :  { %v2135_v59 = vpop.permute.xlu1 %577 }
 0x212   :  { %2860 = vst [vmem:[#allocation25_spill] sm:$0xff] %v2135_v59 }
 0x215   :  { %v2137_v58 = vpop.permute.xlu1 %579 }
 0x216   :  { %2861 = vst [vmem:[#allocation26_spill] sm:$0xff] %v2137_v58 }
 0x226   :  { %v593_v22 = vpop.permute.xlu1 %592 }
 0x227   :  { %v596_v21 = vmul.f32 %v593_v22, %v2087_v30  ;;  %v595_v16 = vmul.f32 %v593_v22, %v2079_v4  ;;  %v597_v13 = vmul.f32 %v593_v22, %v2082_v17  ;;  %v2834_v22 = vmov 23  }
 0x229   :  { %603 = vrot.lane.b32.xlu1 %v596_v21, %s1721_s3  ;;  %601 = vrot.lane.b32.xlu0 %v595_v16, %s1721_s3  ;;  %v2835_v16 = vmov 25  }
 0x22d   :  { %616 = vperm.xlu1 %1589, %v1803_v2   ;;  %605 = vrot.lane.b32.xlu0 %v597_v13, %s1721_s3  ;;  %v2836_v13 = vmov 24  }
 0x22e   :  { %1592 = vset.pattern.permute.xlu0 %v2836_v13 }
 0x231   :  { %1590 = vset.pattern.permute.xlu1 %v2833_v51 }
 0x29b   :  { %v2147_v59 = vpop.permute.xlu1 %603 }
 0x29c   :  { %2862 = vst [vmem:[#allocation27_spill] sm:$0xff] %v2147_v59 }
 0x2ac   :  { %v617_v58 = vpop.permute.xlu1 %616 }
 0x2ad   :  { %v620_v46 = vmul.f32 %v617_v58, %v2087_v30  ;;  %v619_v45 = vmul.f32 %v617_v58, %v2079_v4  ;;  %v621_v21 = vmul.f32 %v617_v58, %v2082_v17  ;;  %v1735_v58 = vmov 0  }
 0x2af   :  { %627 = vrot.lane.b32.xlu1 %v620_v46, %s1722_s22  ;;  %625 = vrot.lane.b32.xlu0 %v619_v45, %s1722_s22  ;;  %v2837_v45 = vmov 26  }
 0x2b3   :  { %640 = vperm.xlu1 %1590, %v1803_v2   ;;  %629 = vrot.lane.b32.xlu0 %v621_v21, %s1722_s22 }
 0x2b7   :  { %1591 = vset.pattern.permute.xlu1 %v2834_v22 }
 0x2b8   :  { %664 = vperm.xlu1 %1591, %v1803_v2  }
 0x2bc   :  { %1594 = vset.pattern.permute.xlu1 %v2835_v16 }
 0x2bd   :  { %712 = vperm.xlu1 %1594, %v1803_v2  }
 0x2c1   :  { %1595 = vset.pattern.permute.xlu1 %v2837_v45  ;;  %v56_v45 = vld [vmem:[%s2790_s2] sm:$0x3f] }
 0x2c2   :  { %736 = vperm.xlu1 %1595, %v1803_v2  }
 0x2c6   :  { %1596 = vset.pattern.permute.xlu1 %v1735_v58 }
 0x321   :  { %v2163_v46 = vpop.permute.xlu1 %627 }
 0x322   :  { %2863 = vst [vmem:[#allocation28_spill] sm:$0xff] %v2163_v46 }
 0x332   :  { %v641_v21 = vpop.permute.xlu1 %640 }
 0x333   :  { %v645_v51 = vmul.f32 %v641_v21, %v2082_v17  ;;  %v643_v22 = vmul.f32 %v641_v21, %v2079_v4  ;;  %v644_v46 = vmul.f32 %v641_v21, %v2087_v30 }
 0x335   :  { %653 = vrot.lane.b32.xlu1 %v645_v51, %s1723_s23  ;;  %649 = vrot.lane.b32.xlu0 %v643_v22, %s1723_s23 }
 0x337   :  { %v665_v16 = vpop.permute.xlu1 %664 }
 0x338   :  { %v668_v13 = vmul.f32 %v665_v16, %v2087_v30  ;;  %v667_v51 = vmul.f32 %v665_v16, %v2079_v4  ;;  %v669_v22 = vmul.f32 %v665_v16, %v2082_v17 }
 0x339   :  { %688 = vperm.xlu0 %1592, %v1803_v2  }
 0x33a   :  { %675 = vrot.lane.b32.xlu1 %v668_v13, %s1724_s24  ;;  %v2182_v13 = vpop.permute.xlu0 %581 }
 0x33b   :  { %2864 = vst [vmem:[#allocation29_spill] sm:$0xff] %v2182_v13  ;;  %v2873_v13 = vmov 3  }
 0x33c   :  { %v713_v16 = vpop.permute.xlu1 %712 }
 0x33d   :  { %1593 = vset.pattern.permute.xlu0 %v1735_v58 }
 0x33e   :  { %59 = vperm.xlu0 %1593, %v56_v45   ;;  %v2184_v59 = vpop.permute.xlu0 %601 }
 0x33f   :  { %2865 = vst [vmem:[#allocation30_spill] sm:$0xff] %v2184_v59 }
 0x342   :  { %92 = vperm.xlu0 %1593, %v1803_v2   ;;  %v2186_v58 = vpop.permute.xlu0 %605 }
 0x343   :  { %2866 = vst [vmem:[#allocation31_spill] sm:$0xff] %v2186_v58 }
 0x346   :  { %651 = vrot.lane.b32.xlu0 %v644_v46, %s1723_s23  ;;  %v2188_v45 = vpop.permute.xlu0 %625 }
 0x347   :  { %2867 = vst [vmem:[#allocation32_spill] sm:$0xff] %v2188_v45  ;;  %v737_v45 = vpop.permute.xlu1 %736 }
 0x348   :  { %v739_v59 = vmul.f32 %v737_v45, %v2079_v4 }
 0x34a   :  { %673 = vrot.lane.b32.xlu0 %v667_v51, %s1724_s24  ;;  %v2190_v2 = vpop.permute.xlu0 %629 }
 0x34b   :  { %2868 = vst [vmem:[#allocation33_spill] sm:$0xff] %v2190_v2  ;;  %v717_v2 = vmul.f32 %v713_v16, %v2082_v17 }
 0x34e   :  { %677 = vrot.lane.b32.xlu0 %v669_v22, %s1724_s24  ;;  %v715_v22 = vmul.f32 %v713_v16, %v2079_v4 }
 0x3a7   :  { %v2192_v21 = vpop.permute.xlu0 %649 }
 0x3a8   :  { %2869 = vst [vmem:[#allocation34_spill] sm:$0xff] %v2192_v21  ;;  %v716_v21 = vmul.f32 %v713_v16, %v2087_v30  ;;  %v2870_v16 = vmov 2  }
 0x3b8   :  { %v689_v46 = vpop.permute.xlu0 %688 }
 0x3b9   :  { %v692_v44 = vmul.f32 %v689_v46, %v2087_v30  ;;  %v691_v51 = vmul.f32 %v689_v46, %v2079_v4  ;;  %v693_v58 = vmul.f32 %v689_v46, %v2082_v17  ;;  %v741_v46 = vmul.f32 %v737_v45, %v2082_v17 }
 0x3ba   :  { %v2874_v17 = vmov 7  }
 0x3bb   :  { %699 = vrot.lane.b32.xlu0 %v692_v44, %s1725_s25  ;;  %697 = vrot.lane.b32.xlu1 %v691_v51, %s1725_s25  ;;  %v740_v44 = vmul.f32 %v737_v45, %v2087_v30  ;;  %v780_v45 = vld [vmem:[%s2792_s4] sm:$0x3f]  ;;  %v2875_v30 = vmov 5   ;;  %s1737_s4 = smov 111  }
 0x3bd   :  { %v60_v51 = vpop.permute.xlu0 %59 }
 0x3bf   :  { %721 = vrot.lane.b32.xlu0 %v715_v22, %s1726_s26  ;;  %701 = vrot.lane.b32.xlu1 %v693_v58, %s1725_s25  ;;  %v53_v58 = vld [vmem:[%s2793_s5] sm:$0x3f]  ;;  %v2871_v22 = vmov 1  }
 0x3c3   :  { %725 = vrot.lane.b32.xlu0 %v717_v2, %s1726_s26  ;;  %723 = vrot.lane.b32.xlu1 %v716_v21, %s1726_s26  ;;  %v55_v2 = vld [vmem:[%s2793_s5 + $0x10] sm:$0x3f]  ;;  %v54_v21 = vld [vmem:[%s2793_s5 + $0x8] sm:$0x3f]  ;;  %s1738_s5 = smov [#allocation7]  }
 0x3c4   :  { %s1519_s14 = sshll.u32 %s1738_s5, 4  ;;  %s1520_s14 = int_to_ptr.vmem [resolvable:$true] %s1519_s14 }
 0x3c5   :  { %s1671_s15 = scalar_lea.vmem %s1520_s14, 384  ;;  %p1676_p3 = scmp.lt.s32.totalorder %s1520_s14, %s1520_s14 }
 0x3c6   :  { %p1672_p2 = scmp.ne.s32.totalorder %s1520_s14, %s1671_s15  ;;  %p1677_p4 = scmp.lt.s32.totalorder %s1671_s15, %s1671_s15 }
 0x3c7   :  { %747 = vrot.lane.b32.xlu0 %v740_v44, %s1727_s27  ;;  %745 = vrot.lane.b32.xlu1 %v739_v59, %s1727_s27  ;;  %v2221_v59 = vld [vmem:[#allocation5] sm:$0x3f]  ;;  %v93_v44 = vpop.permute.xlu0 %92 }
 0x3c8   :  { %p1678_p5 = por %p1677_p4, %p1676_p3 }
 0x3ca   :  { %p1679_p6 = pnand %p1678_p5, %p1672_p2 }
 0x3cb   :  { %765 = vrot.lane.b32.xlu0 %v53_v58, %s1736_s7  ;;  %749 = vrot.lane.b32.xlu1 %v741_v46, %s1727_s27  ;;  %v95_v58 = vmul.f32 %v93_v44, %v1866_v32  ;;  %v96_v46 = vmul.f32 %v93_v44, %v1863_v31  ;;  %v118_v31 = vsel %vm117_vm1, %v2097_v18, %v2000_v47  ;;  %v2877_v18 = vmov 6  }
 0x3cc   :  { %v119_v32 = vsel %vm117_vm1, %v2000_v47, %v2099_v23 }
 0x3cf   :  { %769 = vrot.lane.b32.xlu0 %v55_v2, %s1736_s7  ;;  %767 = vrot.lane.b32.xlu1 %v54_v21, %s1736_s7  ;;  %v97_v2 = vmul.f32 %v93_v44, %v1875_v39  ;;  %v2872_v21 = vmov 4   ;;  %v144_v44 = vsel %vm142_vm2, %v2103_v20, %v2003_v48 }
 0x3d3   :  { %815 = vperm.xlu0 %1593, %v2221_v59   ;;  %783 = vperm.xlu1 %1596, %v780_v45   ;;  %v98_v45 = vadd.f32 %v95_v58, %v60_v51 }
 0x3d5   :  { %v123_v39 = vadd.f32 %v118_v31, %v98_v45 }
 0x3d7   :  { %1598 = vset.pattern.permute.xlu0 %v2870_v16  ;;  %1597 = vset.pattern.permute.xlu1 %v2871_v22  ;;  %v99_v16 = vadd.f32 %v96_v46, %v60_v51  ;;  %v100_v22 = vadd.f32 %v97_v2, %v60_v51  ;;  %v169_v46 = vsel %vm167_vm3, %v2105_v14, %v2008_v52 }
 0x3d8   :  { %849 = vperm.xlu0 %1598, %v2221_v59   ;;  %825 = vperm.xlu1 %1597, %v2221_v59  }
 0x3d9   :  { %v125_v51 = vadd.f32 %v2099_v23, %v100_v22 }
 0x3db   :  { %v150_v23 = vadd.f32 %v2003_v48, %v125_v51  ;;  %v193_v48 = vsel %vm192_vm4, %v2010_v53, %v2107_v9  ;;  %v218_v53 = vsel %vm217_vm5, %v2014_v55, %v2109_v25  ;;  %v2882_v51 = vmov 21  }
 0x3dc   :  { %1600 = vset.pattern.permute.xlu0 %v2872_v21  ;;  %1599 = vset.pattern.permute.xlu1 %v2873_v13  ;;  %v124_v13 = vadd.f32 %v119_v32, %v99_v16  ;;  %v2879_v21 = vmov 8   ;;  %v2880_v32 = vmov 17   ;;  %v244_v55 = vsel %vm242_vm6, %v2111_v24, %v2020_v60 }
 0x3dd   :  { %897 = vperm.xlu0 %1600, %v2221_v59   ;;  %873 = vperm.xlu1 %1599, %v2221_v59   ;;  %v175_v16 = vadd.f32 %v2008_v52, %v150_v23  ;;  %v2881_v52 = vmov 10  }
 0x3de   :  { %v149_v47 = vadd.f32 %v144_v44, %v124_v13  ;;  %v268_v44 = vsel %vm267_vm7, %v2022_v61, %v2113_v7  ;;  %v293_v61 = vsel %vm292_vm8, %v2026_v63, %v2115_v15  ;;  %v333_v63 = vmul.f32 %v1930_v36, %v1937_v40 }
 0x3df   :  { %v200_v31 = vadd.f32 %v2012_v54, %v175_v16 }
 0x3e0   :  { %v174_v45 = vadd.f32 %v169_v46, %v149_v47  ;;  %v269_v47 = vsel %vm267_vm7, %v2113_v7, %v2024_v62  ;;  %v2887_v7 = vmov 18  }
 0x3e1   :  { %1603 = vset.pattern.permute.xlu0 %v2874_v17  ;;  %1601 = vset.pattern.permute.xlu1 %v2875_v30  ;;  %v143_v17 = vsel %vm142_vm2, %v2101_v12, %v2103_v20  ;;  %v2876_v30 = vmov 11   ;;  %v168_v12 = vsel %vm167_vm3, %v2005_v49, %v2105_v14  ;;  %v2878_v20 = vmov 14  }
 0x3e2   :  { %969 = vperm.xlu0 %1603, %v2221_v59   ;;  %921 = vperm.xlu1 %1601, %v2221_v59   ;;  %v148_v58 = vadd.f32 %v143_v17, %v123_v39  ;;  %v194_v49 = vsel %vm192_vm4, %v2107_v9, %v2012_v54  ;;  %v219_v9 = vsel %vm217_vm5, %v2109_v25, %v2016_v56  ;;  %v2883_v17 = vmov 12  }
 0x3e3   :  { %v199_v22 = vadd.f32 %v194_v49, %v174_v45  ;;  %v225_v54 = vadd.f32 %v2016_v56, %v200_v31  ;;  %v334_v45 = vmul.f32 %v1930_v36, %v1955_v50  ;;  %v2888_v49 = vmov 16  }
 0x3e4   :  { %v173_v2 = vadd.f32 %v168_v12, %v148_v58  ;;  %v2884_v58 = vmov 24   ;;  %v294_v12 = vsel %vm292_vm8, %v2115_v15, %v2028_v19  ;;  %v378_v50 = vsel %vm142_vm2, %v2032_v27, %v2121_v8 }
 0x3e5   :  { %v224_v13 = vadd.f32 %v219_v9, %v199_v22  ;;  %v250_v56 = vadd.f32 %v2020_v60, %v225_v54  ;;  %v403_v27 = vsel %vm167_vm3, %v2123_v3, %v2038_v33 }
 0x3e6   :  { %1606 = vset.pattern.permute.xlu0 %v2876_v30  ;;  %1602 = vset.pattern.permute.xlu1 %v2877_v18  ;;  %v198_v14 = vadd.f32 %v193_v48, %v173_v2  ;;  %v243_v30 = vsel %vm242_vm6, %v2018_v57, %v2111_v24  ;;  %v2885_v57 = vmov 13   ;;  %v2886_v2 = vmov 15  }
 0x3e7   :  { %1078 = vperm.xlu0 %1606, %v2221_v59   ;;  %945 = vperm.xlu1 %1602, %v2221_v59   ;;  %v249_v18 = vadd.f32 %v244_v55, %v224_v13  ;;  %v275_v60 = vadd.f32 %v2024_v62, %v250_v56  ;;  %v332_v62 = vmul.f32 %v1930_v36, %v1927_v34  ;;  %v2889_v36 = vmov 19  }
 0x3e8   :  { %v223_v39 = vadd.f32 %v218_v53, %v198_v14  ;;  %v355_v34 = vsel %vm117_vm1, %v2119_v6, %v2030_v26  ;;  %v2891_v13 = vmov 22  }
 0x3e9   :  { %v274_v24 = vadd.f32 %v269_v47, %v249_v18  ;;  %v2893_v18 = vmov 25  }
 0x3ea   :  { %v248_v25 = vadd.f32 %v243_v30, %v223_v39  ;;  %v2892_v30 = vmov 23  }
 0x3eb   :  { %1609 = vset.pattern.permute.xlu0 %v2878_v20  ;;  %1604 = vset.pattern.permute.xlu1 %v2879_v21  ;;  %v299_v20 = vadd.f32 %v294_v12, %v274_v24  ;;  %v300_v21 = vadd.f32 %v2028_v19, %v275_v60  ;;  %v354_v19 = vsel %vm117_vm1, %v2117_v11, %v2119_v6  ;;  %v2897_v24 = vld [vmem:[#allocation19_spill] sm:$0xff]  ;;  %v2898_v60 = vmov 26  }
 0x3ec   :  { %1150 = vperm.xlu0 %1609, %v2221_v59   ;;  %993 = vperm.xlu1 %1604, %v2221_v59   ;;  %v273_v23 = vadd.f32 %v268_v44, %v248_v25  ;;  %v379_v11 = vsel %vm142_vm2, %v2121_v8, %v2034_v28  ;;  %v2895_v44 = vld [vmem:[#allocation16_spill] sm:$0xff] }
 0x3ed   :  { %v336_v16 = vadd.f32 %v333_v63, %v299_v20  ;;  %v337_v48 = vadd.f32 %v334_v45, %v300_v21  ;;  %v2900_v20 = vld [vmem:[#allocation23_spill] sm:$0xff]  ;;  %v2901_v63 = vld [vmem:[#allocation22_spill] sm:$0xff] }
 0x3ee   :  { %v298_v46 = vadd.f32 %v293_v61, %v273_v23  ;;  %v2896_v23 = vld [vmem:[#allocation24_spill] sm:$0xff]  ;;  %v561_v21 = vmul.f32 %v2900_v20, %v2079_v4  ;;  %v562_v45 = vmul.f32 %v2900_v20, %v2901_v63 }
 0x3ef   :  { %v360_v40 = vadd.f32 %v355_v34, %v336_v16  ;;  %v361_v22 = vadd.f32 %v2030_v26, %v337_v48  ;;  %v402_v26 = vsel %vm167_vm3, %v2036_v29, %v2123_v3  ;;  %v427_v29 = vsel %vm192_vm4, %v2125_v5, %v2042_v37  ;;  %v2899_v61 = vld [vmem:[#allocation20_spill] sm:$0xff] }
 0x3f0   :  { %1612 = vset.pattern.permute.xlu0 %v2880_v32  ;;  %1605 = vset.pattern.permute.xlu1 %v2881_v52  ;;  %v335_v15 = vadd.f32 %v332_v62, %v298_v46  ;;  %v2890_v52 = vmov 20   ;;  %v523_v12 = vsel %vm292_vm8, %v2896_v23, %v2899_v61  ;;  %v654_v62 = vpop.permute.xlu1 %653 }
 0x3f1   :  { %1222 = vperm.xlu0 %1612, %v2221_v59   ;;  %1054 = vperm.xlu1 %1605, %v2221_v59   ;;  %v384_v32 = vadd.f32 %v379_v11, %v360_v40  ;;  %v385_v6 = vadd.f32 %v2034_v28, %v361_v22  ;;  %v426_v28 = vsel %vm192_vm4, %v2040_v35, %v2125_v5  ;;  %v2904_v22 = vld [vmem:[#allocation26_spill] sm:$0xff] }
 0x3f2   :  { %v359_v14 = vadd.f32 %v354_v19, %v335_v15  ;;  %v451_v35 = vsel %vm217_vm5, %v2127_v0, %v2046_v41  ;;  %v2902_v15 = vld [vmem:[#allocation21_spill] sm:$0xff] }
 0x3f3   :  { %v408_v9 = vadd.f32 %v403_v27, %v384_v32  ;;  %v409_v8 = vadd.f32 %v2038_v33, %v385_v6  ;;  %v450_v33 = vsel %vm217_vm5, %v2044_v38, %v2127_v0  ;;  %v475_v38 = vsel %vm242_vm6, %v2129_v1, %v2050_v43  ;;  %v2907_v27 = vld [vmem:[#allocation27_spill] sm:$0xff] }
 0x3f4   :  { %v383_v31 = vadd.f32 %v378_v50, %v359_v14  ;;  %v563_v16 = vmul.f32 %v2900_v20, %v2902_v15  ;;  %v676_v14 = vpop.permute.xlu1 %675  ;;  %v2906_v50 = vld [vmem:[#allocation29_spill] sm:$0xff] }
 0x3f5   :  { %1615 = vset.pattern.permute.xlu0 %v2882_v51  ;;  %1607 = vset.pattern.permute.xlu1 %v2883_v17  ;;  %v432_v54 = vadd.f32 %v427_v29, %v408_v9  ;;  %v433_v3 = vadd.f32 %v2042_v37, %v409_v8  ;;  %v474_v37 = vsel %vm242_vm6, %v2048_v42, %v2129_v1  ;;  %v2909_v8 = vld [vmem:[#allocation31_spill] sm:$0xff] }
 0x3f6   :  { %1331 = vperm.xlu0 %1615, %v2221_v59   ;;  %1102 = vperm.xlu1 %1607, %v2221_v59   ;;  %v407_v53 = vadd.f32 %v402_v26, %v383_v31  ;;  %v499_v42 = vsel %vm267_vm7, %v2131_v10, %v2895_v44  ;;  %v584_v11 = vsel %vm117_vm1, %v2904_v22, %v2906_v50 }
 0x3f7   :  { %v456_v17 = vadd.f32 %v451_v35, %v432_v54  ;;  %v457_v5 = vadd.f32 %v2046_v41, %v433_v3  ;;  %v2894_v41 = vld [vmem:[#allocation15_spill] sm:$0xff]  ;;  %v2911_v35 = vld [vmem:[#allocation32_spill] sm:$0xff] }
 0x3f8   :  { %v431_v39 = vadd.f32 %v426_v28, %v407_v53  ;;  %v498_v56 = vsel %vm267_vm7, %v2894_v41, %v2131_v10  ;;  %v2908_v53 = vld [vmem:[#allocation30_spill] sm:$0xff]  ;;  %v608_v28 = vsel %vm142_vm2, %v2907_v27, %v2909_v8 }
 0x3f9   :  { %v480_v25 = vadd.f32 %v475_v38, %v456_v17  ;;  %v481_v0 = vadd.f32 %v2050_v43, %v457_v5  ;;  %v522_v43 = vsel %vm292_vm8, %v2897_v24, %v2896_v23  ;;  %v607_v9 = vsel %vm142_vm2, %v2908_v53, %v2907_v27  ;;  %v2912_v17 = vld [vmem:[#allocation33_spill] sm:$0xff]  ;;  %v2915_v27 = vld [vmem:[#allocation12_spill] sm:$0xff] }
 0x3fa   :  { %1618 = vset.pattern.permute.xlu0 %v2884_v58  ;;  %1608 = vset.pattern.permute.xlu1 %v2885_v57  ;;  %v455_v51 = vadd.f32 %v450_v33, %v431_v39  ;;  %v652_v57 = vpop.permute.xlu0 %651  ;;  %v2910_v33 = vld [vmem:[#allocation28_spill] sm:$0xff] }
 0x3fb   :  { %1403 = vperm.xlu0 %1618, %v2221_v59   ;;  %1126 = vperm.xlu1 %1608, %v2221_v59   ;;  %v504_v47 = vadd.f32 %v499_v42, %v480_v25  ;;  %v505_v1 = vadd.f32 %v2895_v44, %v481_v0  ;;  %v632_v5 = vsel %vm167_vm3, %v2910_v33, %v2912_v17  ;;  %v2913_v0 = vld [vmem:[#allocation34_spill] sm:$0xff] }
 0x3fc   :  { %v479_v55 = vadd.f32 %v474_v37, %v455_v51  ;;  %v631_v51 = vsel %vm167_vm3, %v2911_v35, %v2910_v33  ;;  %v656_v41 = vsel %vm192_vm4, %v652_v57, %v654_v62 }
 0x3fd   :  { %v528_v10 = vadd.f32 %v523_v12, %v504_v47 }
 0x3fe   :  { %v503_v58 = vadd.f32 %v498_v56, %v479_v55 }
 0x3ff   :  { %1610 = vset.pattern.permute.xlu1 %v2886_v2  ;;  %1622 = vset.pattern.permute.xlu0 %v2887_v7  ;;  %v674_v2 = vpop.permute.xlu0 %673  ;;  %v529_v7 = vadd.f32 %v2899_v61, %v505_v1  ;;  %v565_v19 = vadd.f32 %v562_v45, %v528_v10 }
 0x400   :  { %1174 = vperm.xlu1 %1610, %v2221_v59   ;;  %v527_v46 = vadd.f32 %v522_v43, %v503_v58  ;;  %v679_v42 = vsel %vm217_vm5, %v674_v2, %v676_v14 }
 0x401   :  { %v566_v34 = vadd.f32 %v563_v16, %v529_v7  ;;  %v589_v32 = vadd.f32 %v584_v11, %v565_v19 }
 0x402   :  { %v564_v48 = vadd.f32 %v561_v21, %v527_v46 }
 0x403   :  { %v678_v40 = vpop.permute.xlu0 %677  ;;  %v590_v6 = vadd.f32 %v2906_v50, %v566_v34  ;;  %v613_v39 = vadd.f32 %v608_v28, %v589_v32 }
 0x404   :  { %1611 = vset.pattern.permute.xlu1 %v2888_v49  ;;  %v2903_v49 = vmov 9   ;;  %v680_v47 = vsel %vm217_vm5, %v676_v14, %v678_v40 }
 0x405   :  { %1198 = vperm.xlu1 %1611, %v2221_v59   ;;  %v637_v37 = vadd.f32 %v632_v5, %v613_v39 }
 0x407   :  { %v661_v44 = vadd.f32 %v656_v41, %v637_v37 }
 0x409   :  { %1613 = vset.pattern.permute.xlu1 %v2889_v36  ;;  %v2905_v36 = vld [vmem:[#allocation25_spill] sm:$0xff]  ;;  %v685_v12 = vadd.f32 %v680_v47, %v661_v44 }
 0x40a   :  { %1283 = vperm.xlu1 %1613, %v2221_v59   ;;  %v583_v4 = vsel %vm117_vm1, %v2905_v36, %v2904_v22 }
 0x40b   :  { %v588_v31 = vadd.f32 %v583_v4, %v564_v48 }
 0x40d   :  { %v612_v29 = vadd.f32 %v607_v9, %v588_v31 }
 0x40e   :  { %1614 = vset.pattern.permute.xlu1 %v2890_v52 }
 0x40f   :  { %1307 = vperm.xlu1 %1614, %v2221_v59  }
 0x413   :  { %1616 = vset.pattern.permute.xlu1 %v2891_v13  ;;  %v614_v13 = vadd.f32 %v2909_v8, %v590_v6 }
 0x414   :  { %1355 = vperm.xlu1 %1616, %v2221_v59  }
 0x415   :  { %v638_v38 = vadd.f32 %v2912_v17, %v614_v13 }
 0x417   :  { %v662_v58 = vadd.f32 %v654_v62, %v638_v38 }
 0x418   :  { %1617 = vset.pattern.permute.xlu1 %v2892_v30  ;;  %v636_v30 = vadd.f32 %v631_v51, %v612_v29 }
 0x419   :  { %1379 = vperm.xlu1 %1617, %v2221_v59   ;;  %v686_v46 = vadd.f32 %v678_v40, %v662_v58 }
 0x41d   :  { %1619 = vset.pattern.permute.xlu1 %v2893_v18  ;;  %v655_v18 = vsel %vm192_vm4, %v2913_v0, %v652_v57 }
 0x41e   :  { %1427 = vperm.xlu1 %1619, %v2221_v59   ;;  %v660_v56 = vadd.f32 %v655_v18, %v636_v30 }
 0x420   :  { %v684_v43 = vadd.f32 %v679_v42, %v660_v56 }
 0x422   :  { %1620 = vset.pattern.permute.xlu1 %v2898_v60 }
 0x423   :  { %1451 = vperm.xlu1 %1620, %v2221_v59  }
 0x427   :  { %1621 = vset.pattern.permute.xlu1 %v2903_v49 }
 0x428   :  { %1044 = vperm.xlu1 %1621, %v2221_v59  }
 0x42d   :  { %v698_v26 = vpop.permute.xlu1 %697  ;;  %v700_v52 = vpop.permute.xlu0 %699 }
 0x42e   :  { %v703_v24 = vsel %vm242_vm6, %v698_v26, %v700_v52  ;;  %v2914_v26 = vld [vmem:[#allocation11_spill] sm:$0xff] }
 0x42f   :  { %v708_v7 = vadd.f32 %v703_v24, %v684_v43 }
 0x431   :  { %v702_v54 = vpop.permute.xlu1 %701  ;;  %v722_v3 = vpop.permute.xlu0 %721 }
 0x432   :  { %v704_v61 = vsel %vm242_vm6, %v700_v52, %v702_v54  ;;  %v710_v2 = vadd.f32 %v702_v54, %v686_v46 }
 0x433   :  { %v709_v21 = vadd.f32 %v704_v61, %v685_v12 }
 0x435   :  { %v724_v55 = vpop.permute.xlu1 %723  ;;  %v726_v25 = vpop.permute.xlu0 %725 }
 0x436   :  { %v727_v10 = vsel %vm267_vm7, %v722_v3, %v724_v55  ;;  %v728_v57 = vsel %vm267_vm7, %v724_v55, %v726_v25  ;;  %v734_v48 = vadd.f32 %v726_v25, %v710_v2 }
 0x437   :  { %v732_v45 = vadd.f32 %v727_v10, %v708_v7  ;;  %v733_v16 = vadd.f32 %v728_v57, %v709_v21 }
 0x439   :  { %v746_v1 = vpop.permute.xlu1 %745  ;;  %v748_v23 = vpop.permute.xlu0 %747 }
 0x43a   :  { %v751_v62 = vsel %vm292_vm8, %v746_v1, %v748_v23 }
 0x43b   :  { %v756_v49 = vadd.f32 %v751_v62, %v732_v45 }
 0x43d   :  { %v750_v20 = vpop.permute.xlu1 %749  ;;  %v766_v63 = vpop.permute.xlu0 %765  ;;  %v759_v22 = vmax.f32 %v756_v49, 0.0 }
 0x43e   :  { %v752_v15 = vsel %vm292_vm8, %v748_v23, %v750_v20  ;;  %v758_v34 = vadd.f32 %v750_v20, %v734_v48 }
 0x43f   :  { %v757_v19 = vadd.f32 %v752_v15, %v733_v16  ;;  %v2437_v31 = vmul.f32 %v766_v63, %v759_v22 }
 0x440   :  { %v761_v4 = vmax.f32 %v758_v34, 0.0  ;;  %v2916_v34 = vld [vmem:[#allocation13_spill] sm:$0xff] }
 0x441   :  { %v768_v14 = vpop.permute.xlu1 %767  ;;  %v770_v40 = vpop.permute.xlu0 %769  ;;  %v760_v36 = vmax.f32 %v757_v19, 0.0  ;;  %v789_v52 = vrot.slane %v2437_v31, %v2914_v26  ;;  %v801_v53 = vrot.slane %v2437_v31, %v2915_v27 }
 0x442   :  { %v772_v50 = vsel %vm771_vm9, %v766_v63, %v768_v14  ;;  %v773_v11 = vsel %vm771_vm9, %v768_v14, %v770_v40  ;;  %v1019_v14 = vrot.slane %v2437_v31, %v2916_v34  ;;  %v2917_v40 = vld [vmem:[#allocation14_spill] sm:$0xff] }
 0x443   :  { %v2439_v32 = vmul.f32 %v772_v50, %v760_v36  ;;  %v2441_v6 = vmul.f32 %v773_v11, %v761_v4  ;;  %v810_v13 = vsel %vm86_vm0, %v789_v52, %v801_v53  ;;  %v1031_v22 = vrot.slane %v2437_v31, %v2917_v40 }
 0x445   :  { %v793_v9 = vrot.slane %v2439_v32, %v2914_v26  ;;  %v805_v8 = vrot.slane %v2439_v32, %v2915_v27  ;;  %v797_v28 = vrot.slane %v2441_v6, %v2914_v26  ;;  %v809_v29 = vrot.slane %v2441_v6, %v2915_v27 }
 0x446   :  { %v1023_v36 = vrot.slane %v2439_v32, %v2916_v34  ;;  %v1035_v4 = vrot.slane %v2439_v32, %v2917_v40  ;;  %v1027_v26 = vrot.slane %v2441_v6, %v2916_v34  ;;  %v1039_v52 = vrot.slane %v2441_v6, %v2917_v40 }
 0x447   :  { %v2459_v54 = vsel %vm86_vm0, %v793_v9, %v805_v8  ;;  %v2462_v3 = vsel %vm86_vm0, %v797_v28, %v809_v29  ;;  %v2528_v27 = vsel %vm86_vm0, %v1019_v14, %v1031_v22 }
 0x448   :  { %v2534_v9 = vsel %vm86_vm0, %v1023_v36, %v1035_v4 }
 0x452   :  { %v2455_v39 = vpop.permute.xlu1 %783  ;;  %v816_v33 = vpop.permute.xlu0 %815 }
 0x453   :  { %v2464_v35 = vmul.f32 %v816_v33, %v810_v13  ;;  %v2467_v51 = vmul.f32 %v816_v33, %v2459_v54  ;;  %v2470_v17 = vmul.f32 %v816_v33, %v2462_v3 }
 0x457   :  { %v826_v5 = vpop.permute.xlu1 %825  ;;  %v850_v30 = vpop.permute.xlu0 %849 }
 0x458   :  { %v830_v37 = vmul.f32 %v826_v5, %v2462_v3  ;;  %v854_v38 = vmul.f32 %v850_v30, %v2462_v3  ;;  %v828_v56 = vmul.f32 %v826_v5, %v810_v13  ;;  %v829_v42 = vmul.f32 %v826_v5, %v2459_v54 }
 0x459   :  { %v852_v58 = vmul.f32 %v850_v30, %v810_v13  ;;  %v853_v1 = vmul.f32 %v850_v30, %v2459_v54 }
 0x45a   :  { %838 = vrot.lane.b32.xlu1 %v830_v37, %s1720_s1  ;;  %862 = vrot.lane.b32.xlu0 %v854_v38, %s1721_s3 }
 0x45c   :  { %v874_v55 = vpop.permute.xlu1 %873  ;;  %v898_v25 = vpop.permute.xlu0 %897 }
 0x45d   :  { %v878_v0 = vmul.f32 %v874_v55, %v2462_v3  ;;  %v902_v18 = vmul.f32 %v898_v25, %v2462_v3  ;;  %v876_v23 = vmul.f32 %v874_v55, %v810_v13  ;;  %v877_v43 = vmul.f32 %v874_v55, %v2459_v54 }
 0x45e   :  { %v901_v61 = vmul.f32 %v898_v25, %v2459_v54  ;;  %v900_v46 = vmul.f32 %v898_v25, %v810_v13 }
 0x45f   :  { %886 = vrot.lane.b32.xlu0 %v878_v0, %s1722_s22  ;;  %910 = vrot.lane.b32.xlu1 %v902_v18, %s1723_s23 }
 0x461   :  { %v922_v41 = vpop.permute.xlu1 %921  ;;  %v970_v62 = vpop.permute.xlu0 %969 }
 0x462   :  { %v926_v44 = vmul.f32 %v922_v41, %v2462_v3  ;;  %v924_v10 = vmul.f32 %v922_v41, %v810_v13  ;;  %v925_v57 = vmul.f32 %v922_v41, %v2459_v54  ;;  %v972_v45 = vmul.f32 %v970_v62, %v810_v13 }
 0x463   :  { %834 = vrot.lane.b32.xlu1 %v828_v56, %s1720_s1  ;;  %v973_v15 = vmul.f32 %v970_v62, %v2459_v54  ;;  %v974_v48 = vmul.f32 %v970_v62, %v2462_v3 }
 0x464   :  { %934 = vrot.lane.b32.xlu0 %v926_v44, %s1724_s24 }
 0x466   :  { %v946_v47 = vpop.permute.xlu1 %945  ;;  %v1079_v29 = vpop.permute.xlu0 %1078 }
 0x467   :  { %858 = vrot.lane.b32.xlu1 %v852_v58, %s1721_s3  ;;  %v948_v20 = vmul.f32 %v946_v47, %v810_v13  ;;  %v949_v21 = vmul.f32 %v946_v47, %v2459_v54  ;;  %v950_v63 = vmul.f32 %v946_v47, %v2462_v3  ;;  %v1081_v33 = vmul.f32 %v1079_v29, %v2528_v27 }
 0x468   :  { %836 = vrot.lane.b32.xlu0 %v829_v42, %s1720_s1  ;;  %v1082_v5 = vmul.f32 %v1079_v29, %v2534_v9 }
 0x46b   :  { %v994_v24 = vpop.permute.xlu1 %993  ;;  %860 = vrot.lane.b32.xlu1 %v853_v1, %s1721_s3  ;;  %v1151_v44 = vpop.permute.xlu0 %1150 }
 0x46c   :  { %882 = vrot.lane.b32.xlu0 %v876_v23, %s1722_s22  ;;  %v996_v49 = vmul.f32 %v994_v24, %v810_v13  ;;  %v997_v50 = vmul.f32 %v994_v24, %v2459_v54  ;;  %v998_v11 = vmul.f32 %v994_v24, %v2462_v3  ;;  %v1042_v13 = vsel %vm86_vm0, %v1027_v26, %v1039_v52 }
 0x46d   :  { %v1083_v30 = vmul.f32 %v1079_v29, %v1042_v13  ;;  %v1153_v58 = vmul.f32 %v1151_v44, %v2528_v27  ;;  %v1154_v1 = vmul.f32 %v1151_v44, %v2534_v9  ;;  %v1155_v23 = vmul.f32 %v1151_v44, %v1042_v13 }
 0x46f   :  { %884 = vrot.lane.b32.xlu1 %v877_v43, %s1722_s22 }
 0x470   :  { %v1055_v12 = vpop.permute.xlu1 %1054  ;;  %908 = vrot.lane.b32.xlu0 %v901_v61, %s1723_s23 }
 0x471   :  { %v1057_v8 = vmul.f32 %v1055_v12, %v2528_v27  ;;  %v1058_v28 = vmul.f32 %v1055_v12, %v2534_v9  ;;  %v1059_v54 = vmul.f32 %v1055_v12, %v1042_v13 }
 0x473   :  { %906 = vrot.lane.b32.xlu1 %v900_v46, %s1723_s23 }
 0x474   :  { %930 = vrot.lane.b32.xlu0 %v924_v10, %s1724_s24 }
 0x475   :  { %v1103_v7 = vpop.permute.xlu1 %1102 }
 0x476   :  { %v1105_v38 = vmul.f32 %v1103_v7, %v2528_v27  ;;  %v1106_v55 = vmul.f32 %v1103_v7, %v2534_v9  ;;  %v1107_v0 = vmul.f32 %v1103_v7, %v1042_v13 }
 0x477   :  { %932 = vrot.lane.b32.xlu1 %v925_v57, %s1724_s24  ;;  %v1223_v57 = vpop.permute.xlu0 %1222 }
 0x478   :  { %954 = vrot.lane.b32.xlu0 %v948_v20, %s1725_s25  ;;  %v1225_v20 = vmul.f32 %v1223_v57, %v2528_v27 }
 0x47a   :  { %v1127_v2 = vpop.permute.xlu1 %1126 }
 0x47b   :  { %956 = vrot.lane.b32.xlu1 %v949_v21, %s1725_s25  ;;  %v1129_v18 = vmul.f32 %v1127_v2, %v2528_v27  ;;  %v1130_v56 = vmul.f32 %v1127_v2, %v2534_v9  ;;  %v1131_v42 = vmul.f32 %v1127_v2, %v1042_v13  ;;  %v2918_v21 = vld [vmem:[#allocation17_spill] sm:$0xff]  ;;  %v2919_v2 = vld [vmem:[#allocation18_spill] sm:$0xff]  ;;  %v1332_v36 = vpop.permute.xlu0 %1331 }
 0x47c   :  { %958 = vrot.lane.b32.xlu0 %v950_v63, %s1725_s25  ;;  %v1264_v62 = vrot.slane %v2439_v32, %v2919_v2  ;;  %v1268_v34 = vrot.slane %v2441_v6, %v2919_v2 }
 0x47f   :  { %v2503_v16 = vpop.permute.xlu1 %1174  ;;  %978 = vrot.lane.b32.xlu1 %v972_v45, %s1726_s26  ;;  %v1227_v45 = vmul.f32 %v1223_v57, %v1042_v13  ;;  %v1404_v26 = vpop.permute.xlu0 %1403 }
 0x480   :  { %980 = vrot.lane.b32.xlu0 %v973_v15, %s1726_s26  ;;  %v1177_v12 = vmul.f32 %v2503_v16, %v2528_v27  ;;  %v1179_v46 = vmul.f32 %v2503_v16, %v1042_v13  ;;  %v1178_v10 = vmul.f32 %v2503_v16, %v2534_v9  ;;  %v1248_v15 = vrot.slane %v2437_v31, %v2918_v21 }
 0x481   :  { %v1260_v16 = vrot.slane %v2437_v31, %v2919_v2 }
 0x483   :  { %982 = vrot.lane.b32.xlu1 %v974_v48, %s1726_s26  ;;  %v1226_v48 = vmul.f32 %v1223_v57, %v2534_v9  ;;  %v2622_v31 = vsel %vm86_vm0, %v1248_v15, %v1260_v16 }
 0x484   :  { %v2509_v19 = vpop.permute.xlu1 %1198  ;;  %1002 = vrot.lane.b32.xlu0 %v996_v49, %s1727_s27  ;;  %v1334_v52 = vmul.f32 %v1332_v36, %v2622_v31  ;;  %v1406_v44 = vmul.f32 %v1404_v26, %v2622_v31 }
 0x485   :  { %v1202_v7 = vmul.f32 %v2509_v19, %v2534_v9  ;;  %v1203_v63 = vmul.f32 %v2509_v19, %v1042_v13 }
 0x487   :  { %1004 = vrot.lane.b32.xlu1 %v997_v50, %s1727_s27 }
 0x488   :  { %1006 = vrot.lane.b32.xlu0 %v998_v11, %s1727_s27 }
 0x489   :  { %v2531_v53 = vpop.permute.xlu1 %1283 }
 0x48a   :  { %v1286_v14 = vmul.f32 %v2531_v53, %v2622_v31 }
 0x48b   :  { %1063 = vrot.lane.b32.xlu1 %v1057_v8, %s1720_s1 }
 0x48c   :  { %1065 = vrot.lane.b32.xlu0 %v1058_v28, %s1720_s1 }
 0x48e   :  { %v2541_v3 = vpop.permute.xlu1 %1307 }
 0x48f   :  { %1067 = vrot.lane.b32.xlu1 %v1059_v54, %s1720_s1  ;;  %v1310_v40 = vmul.f32 %v2541_v3, %v2622_v31 }
 0x490   :  { %1087 = vrot.lane.b32.xlu0 %v1081_v33, %s1721_s3 }
 0x493   :  { %v2547_v37 = vpop.permute.xlu1 %1355  ;;  %1089 = vrot.lane.b32.xlu1 %v1082_v5, %s1721_s3 }
 0x494   :  { %1091 = vrot.lane.b32.xlu0 %v1083_v30, %s1721_s3 }
 0x497   :  { %1111 = vrot.lane.b32.xlu1 %v1105_v38, %s1722_s22 }
 0x498   :  { %v2554_v25 = vpop.permute.xlu1 %1379  ;;  %1113 = vrot.lane.b32.xlu0 %v1106_v55, %s1722_s22 }
 0x49b   :  { %1115 = vrot.lane.b32.xlu1 %v1107_v0, %s1722_s22  ;;  %v1382_v0 = vmul.f32 %v2554_v25, %v2622_v31 }
 0x49c   :  { %1135 = vrot.lane.b32.xlu0 %v1129_v18, %s1723_s23 }
 0x49d   :  { %v2560_v41 = vpop.permute.xlu1 %1427 }
 0x49f   :  { %1137 = vrot.lane.b32.xlu1 %v1130_v56, %s1723_s23 }
 0x4a0   :  { %1139 = vrot.lane.b32.xlu0 %v1131_v42, %s1723_s23 }
 0x4a2   :  { %v2566_v47 = vpop.permute.xlu1 %1451 }
 0x4a3   :  { %1159 = vrot.lane.b32.xlu1 %v1153_v58, %s1724_s24 }
 0x4a4   :  { %1161 = vrot.lane.b32.xlu0 %v1154_v1, %s1724_s24  ;;  %v821_v1 = vadd.f32 %v2464_v35, %v2455_v39 }
 0x4a7   :  { %v2571_v24 = vpop.permute.xlu1 %1044  ;;  %1163 = vrot.lane.b32.xlu1 %v1155_v23, %s1724_s24  ;;  %v822_v23 = vadd.f32 %v2467_v51, %v2455_v39 }
 0x4a8   :  { %v2575_v43 = vmul.f32 %v2571_v24, %v2534_v9  ;;  %v2578_v61 = vmul.f32 %v2571_v24, %v1042_v13  ;;  %1273 = vperm.xlu0 %1622, %v2221_v59   ;;  %v1201_v59 = vmul.f32 %v2509_v19, %v2528_v27  ;;  %v1256_v19 = vrot.slane %v2441_v6, %v2918_v21 }
 0x4a9   :  { %v823_v9 = vadd.f32 %v2470_v17, %v2455_v39 }
 0x4aa   :  { %v2631_v22 = vsel %vm86_vm0, %v1256_v19, %v1268_v34 }
 0x4ab   :  { %1183 = vrot.lane.b32.xlu1 %v1177_v12, %s1725_s25  ;;  %v1288_v6 = vmul.f32 %v2531_v53, %v2631_v22  ;;  %v1312_v4 = vmul.f32 %v2541_v3, %v2631_v22  ;;  %v1336_v13 = vmul.f32 %v1332_v36, %v2631_v22  ;;  %v1360_v54 = vmul.f32 %v2547_v37, %v2631_v22 }
 0x4ac   :  { %1187 = vrot.lane.b32.xlu0 %v1179_v46, %s1725_s25  ;;  %v1408_v46 = vmul.f32 %v1404_v26, %v2631_v22 }
 0x4ad   :  { %1623 = vset.pattern.permute.xlu0 %v2898_v60  ;;  %v1252_v60 = vrot.slane %v2439_v32, %v2918_v21 }
 0x4af   :  { %1185 = vrot.lane.b32.xlu1 %v1178_v10, %s1725_s25  ;;  %v2612_v49 = vsel %vm86_vm0, %v1252_v60, %v1264_v62  ;;  %v1430_v62 = vmul.f32 %v2560_v41, %v2622_v31 }
 0x4b0   :  { %1209 = vrot.lane.b32.xlu0 %v1202_v7, %s1726_s26  ;;  %v1287_v32 = vmul.f32 %v2531_v53, %v2612_v49  ;;  %v1311_v50 = vmul.f32 %v2541_v3, %v2612_v49  ;;  %v1335_v11 = vmul.f32 %v1332_v36, %v2612_v49  ;;  %v1358_v53 = vmul.f32 %v2547_v37, %v2622_v31 }
 0x4b1   :  { %v1359_v17 = vmul.f32 %v2547_v37, %v2612_v49  ;;  %v1383_v38 = vmul.f32 %v2554_v25, %v2612_v49  ;;  %v1384_v37 = vmul.f32 %v2554_v25, %v2631_v22  ;;  %v1407_v25 = vmul.f32 %v1404_v26, %v2612_v49 }
 0x4b2   :  { %v1431_v35 = vmul.f32 %v2560_v41, %v2612_v49  ;;  %v1456_v36 = vmul.f32 %v2566_v47, %v2631_v22  ;;  %v1455_v26 = vmul.f32 %v2566_v47, %v2612_v49 }
 0x4b3   :  { %1207 = vrot.lane.b32.xlu1 %v1201_v59, %s1726_s26 }
 0x4b4   :  { %1231 = vrot.lane.b32.xlu0 %v1225_v20, %s1727_s27 }
 0x4b7   :  { %1211 = vrot.lane.b32.xlu1 %v1203_v63, %s1726_s26 }
 0x4b8   :  { %1235 = vrot.lane.b32.xlu0 %v1227_v45, %s1727_s27  ;;  %v1454_v45 = vmul.f32 %v2566_v47, %v2622_v31 }
 0x4bb   :  { %1233 = vrot.lane.b32.xlu1 %v1226_v48, %s1727_s27 }
 0x4bc   :  { %1294 = vrot.lane.b32.xlu0 %v1287_v32, %s1720_s1 }
 0x4bf   :  { %1292 = vrot.lane.b32.xlu1 %v1286_v14, %s1720_s1  ;;  %v1432_v14 = vmul.f32 %v2560_v41, %v2631_v22 }
 0x4c0   :  { %1316 = vrot.lane.b32.xlu0 %v1310_v40, %s1721_s3 }
 0x4c3   :  { %1296 = vrot.lane.b32.xlu1 %v1288_v6, %s1720_s1 }
 0x4c4   :  { %1320 = vrot.lane.b32.xlu0 %v1312_v4, %s1721_s3 }
 0x4c7   :  { %1318 = vrot.lane.b32.xlu1 %v1311_v50, %s1721_s3 }
 0x4c8   :  { %1342 = vrot.lane.b32.xlu0 %v1335_v11, %s1722_s22 }
 0x4cb   :  { %1340 = vrot.lane.b32.xlu1 %v1334_v52, %s1722_s22 }
 0x4cc   :  { %v839_v8 = vpop.permute.xlu1 %838  ;;  %1364 = vrot.lane.b32.xlu0 %v1358_v53, %s1723_s23  ;;  %v863_v29 = vpop.permute.xlu0 %862 }
 0x4cd   :  { %v847_v28 = vadd.f32 %v839_v8, %v823_v9 }
 0x4cf   :  { %v871_v3 = vadd.f32 %v863_v29, %v847_v28  ;;  %1344 = vrot.lane.b32.xlu1 %v1336_v13, %s1722_s22 }
 0x4d0   :  { %1368 = vrot.lane.b32.xlu0 %v1360_v54, %s1723_s23 }
 0x4d1   :  { %v887_v33 = vpop.permute.xlu0 %886  ;;  %v911_v5 = vpop.permute.xlu1 %910 }
 0x4d2   :  { %v895_v30 = vadd.f32 %v887_v33, %v871_v3 }
 0x4d3   :  { %1366 = vrot.lane.b32.xlu1 %v1359_v17, %s1723_s23 }
 0x4d4   :  { %v919_v55 = vadd.f32 %v911_v5, %v895_v30  ;;  %1390 = vrot.lane.b32.xlu0 %v1383_v38, %s1724_s24 }
 0x4d5   :  { %v835_v18 = vpop.permute.xlu1 %834 }
 0x4d6   :  { %v935_v56 = vpop.permute.xlu0 %934 }
 0x4d7   :  { %v943_v42 = vadd.f32 %v935_v56, %v919_v55  ;;  %1388 = vrot.lane.b32.xlu1 %v1382_v0, %s1724_s24 }
 0x4d8   :  { %1412 = vrot.lane.b32.xlu0 %v1406_v44, %s1725_s25 }
 0x4d9   :  { %v859_v58 = vpop.permute.xlu1 %858 }
 0x4da   :  { %v837_v12 = vpop.permute.xlu0 %836 }
 0x4db   :  { %v840_v10 = vsel %vm117_vm1, %v835_v18, %v837_v12  ;;  %v841_v7 = vsel %vm117_vm1, %v837_v12, %v839_v8  ;;  %1392 = vrot.lane.b32.xlu1 %v1384_v37, %s1724_s24  ;;  %v1626_v18 = vld [vmem:[#allocation2 + $0x10] sm:$0x3f] }
 0x4dc   :  { %v845_v57 = vadd.f32 %v840_v10, %v821_v1  ;;  %v846_v59 = vadd.f32 %v841_v7, %v822_v23  ;;  %1416 = vrot.lane.b32.xlu0 %v1408_v46, %s1725_s25  ;;  %v1047_v10 = vmul.f32 %v2571_v24, %v2528_v27 }
 0x4dd   :  { %v861_v20 = vpop.permute.xlu1 %860 }
 0x4de   :  { %v864_v39 = vsel %vm142_vm2, %v859_v58, %v861_v20  ;;  %v865_v51 = vsel %vm142_vm2, %v861_v20, %v863_v29  ;;  %v883_v21 = vpop.permute.xlu0 %882  ;;  %v1624_v29 = vld [vmem:[#allocation2 + $0x8] sm:$0x3f] }
 0x4df   :  { %v869_v60 = vadd.f32 %v864_v39, %v845_v57  ;;  %v870_v2 = vadd.f32 %v865_v51, %v846_v59  ;;  %1414 = vrot.lane.b32.xlu1 %v1407_v25, %s1725_s25 }
 0x4e0   :  { %1438 = vrot.lane.b32.xlu0 %v1431_v35, %s1726_s26 }
 0x4e1   :  { %v885_v63 = vpop.permute.xlu1 %884 }
 0x4e2   :  { %v888_v15 = vsel %vm167_vm3, %v883_v21, %v885_v63  ;;  %v889_v16 = vsel %vm167_vm3, %v885_v63, %v887_v33  ;;  %v909_v48 = vpop.permute.xlu0 %908 }
 0x4e3   :  { %v893_v32 = vadd.f32 %v888_v15, %v869_v60  ;;  %v894_v19 = vadd.f32 %v889_v16, %v870_v2  ;;  %v913_v34 = vsel %vm192_vm4, %v909_v48, %v911_v5  ;;  %1436 = vrot.lane.b32.xlu1 %v1430_v62, %s1726_s26  ;;  %v1625_v5 = vld [vmem:[#allocation2] sm:$0x3f] }
 0x4e4   :  { %1460 = vrot.lane.b32.xlu0 %v1454_v45, %s1727_s27 }
 0x4e5   :  { %v918_v40 = vadd.f32 %v913_v34, %v894_v19  ;;  %v907_v6 = vpop.permute.xlu1 %906 }
 0x4e6   :  { %v912_v4 = vsel %vm192_vm4, %v907_v6, %v909_v48  ;;  %v931_v50 = vpop.permute.xlu0 %930 }
 0x4e7   :  { %v917_v11 = vadd.f32 %v912_v4, %v893_v32  ;;  %1440 = vrot.lane.b32.xlu1 %v1432_v14, %s1726_s26 }
 0x4e8   :  { %1464 = vrot.lane.b32.xlu0 %v1456_v36, %s1727_s27 }
 0x4e9   :  { %v933_v52 = vpop.permute.xlu1 %932 }
 0x4ea   :  { %v936_v53 = vsel %vm217_vm5, %v931_v50, %v933_v52  ;;  %v937_v41 = vsel %vm217_vm5, %v933_v52, %v935_v56  ;;  %v955_v9 = vpop.permute.xlu0 %954 }
 0x4eb   :  { %v941_v8 = vadd.f32 %v936_v53, %v917_v11  ;;  %v942_v28 = vadd.f32 %v937_v41, %v918_v40  ;;  %1462 = vrot.lane.b32.xlu1 %v1455_v26, %s1727_s27 }
 0x4ec   :  { %1482 = vrot.lane.b32.xlu0 %v1624_v29, %s1727_s27 }
 0x4ed   :  { %v957_v13 = vpop.permute.xlu1 %956 }
 0x4ee   :  { %v960_v54 = vsel %vm242_vm6, %v955_v9, %v957_v13  ;;  %v959_v3 = vpop.permute.xlu0 %958 }
 0x4ef   :  { %v965_v33 = vadd.f32 %v960_v54, %v941_v8  ;;  %v961_v47 = vsel %vm242_vm6, %v957_v13, %v959_v3  ;;  %v967_v17 = vadd.f32 %v959_v3, %v943_v42  ;;  %1480 = vrot.lane.b32.xlu1 %v1625_v5, %s1727_s27 }
 0x4f0   :  { %v966_v30 = vadd.f32 %v961_v47, %v942_v28 }
 0x4f1   :  { %v979_v38 = vpop.permute.xlu1 %978 }
 0x4f2   :  { %v981_v55 = vpop.permute.xlu0 %980 }
 0x4f3   :  { %v984_v0 = vsel %vm267_vm7, %v979_v38, %v981_v55  ;;  %1484 = vrot.lane.b32.xlu1 %v1626_v18, %s1727_s27 }
 0x4f4   :  { %v989_v56 = vadd.f32 %v984_v0, %v965_v33 }
 0x4f5   :  { %v983_v44 = vpop.permute.xlu1 %982 }
 0x4f6   :  { %v985_v37 = vsel %vm267_vm7, %v981_v55, %v983_v44  ;;  %v991_v58 = vadd.f32 %v983_v44, %v967_v17  ;;  %v1003_v1 = vpop.permute.xlu0 %1002 }
 0x4f7   :  { %v990_v23 = vadd.f32 %v985_v37, %v966_v30 }
 0x4f9   :  { %v1005_v12 = vpop.permute.xlu1 %1004 }
 0x4fa   :  { %v1008_v42 = vsel %vm292_vm8, %v1003_v1, %v1005_v12  ;;  %v1007_v46 = vpop.permute.xlu0 %1006 }
 0x4fb   :  { %v1013_v7 = vadd.f32 %v1008_v42, %v989_v56  ;;  %v1009_v57 = vsel %vm292_vm8, %v1005_v12, %v1007_v46  ;;  %v1015_v59 = vadd.f32 %v1007_v46, %v991_v58 }
 0x4fc   :  { %v1014_v25 = vadd.f32 %v1009_v57, %v990_v23 }
 0x4fd   :  { %v1064_v20 = vpop.permute.xlu1 %1063  ;;  %v1050_v35 = vadd.f32 %v1047_v10, %v1013_v7  ;;  %v1052_v39 = vadd.f32 %v2578_v61, %v1015_v59 }
 0x4fe   :  { %v1066_v51 = vpop.permute.xlu0 %1065  ;;  %v1051_v21 = vadd.f32 %v2575_v43, %v1014_v25 }
 0x4ff   :  { %v1069_v60 = vsel %vm117_vm1, %v1064_v20, %v1066_v51 }
 0x500   :  { %v1074_v2 = vadd.f32 %v1069_v60, %v1050_v35 }
 0x501   :  { %v1068_v62 = vpop.permute.xlu1 %1067 }
 0x502   :  { %v1070_v63 = vsel %vm117_vm1, %v1066_v51, %v1068_v62  ;;  %v1076_v45 = vadd.f32 %v1068_v62, %v1052_v39  ;;  %v1088_v24 = vpop.permute.xlu0 %1087 }
 0x503   :  { %v1075_v27 = vadd.f32 %v1070_v63, %v1051_v21 }
 0x505   :  { %v1090_v15 = vpop.permute.xlu1 %1089 }
 0x506   :  { %v1092_v48 = vpop.permute.xlu0 %1091  ;;  %v1093_v55 = vsel %vm142_vm2, %v1088_v24, %v1090_v15 }
 0x507   :  { %v1100_v33 = vadd.f32 %v1092_v48, %v1076_v45  ;;  %v1094_v0 = vsel %vm142_vm2, %v1090_v15, %v1092_v48  ;;  %v1098_v58 = vadd.f32 %v1093_v55, %v1074_v2 }
 0x508   :  { %v1099_v1 = vadd.f32 %v1094_v0, %v1075_v27 }
 0x509   :  { %v1112_v16 = vpop.permute.xlu1 %1111 }
 0x50a   :  { %v1114_v19 = vpop.permute.xlu0 %1113 }
 0x50b   :  { %v1117_v44 = vsel %vm167_vm3, %v1112_v16, %v1114_v19 }
 0x50c   :  { %v1122_v10 = vadd.f32 %v1117_v44, %v1098_v58 }
 0x50d   :  { %v1116_v32 = vpop.permute.xlu1 %1115 }
 0x50e   :  { %v1136_v61 = vpop.permute.xlu0 %1135  ;;  %v1124_v17 = vadd.f32 %v1116_v32, %v1100_v33  ;;  %v1118_v37 = vsel %vm167_vm3, %v1114_v19, %v1116_v32 }
 0x50f   :  { %v1123_v7 = vadd.f32 %v1118_v37, %v1099_v1 }
 0x511   :  { %v1138_v34 = vpop.permute.xlu1 %1137 }
 0x512   :  { %v1140_v6 = vpop.permute.xlu0 %1139  ;;  %v1141_v42 = vsel %vm192_vm4, %v1136_v61, %v1138_v34 }
 0x513   :  { %v1148_v30 = vadd.f32 %v1140_v6, %v1124_v17  ;;  %v1142_v46 = vsel %vm192_vm4, %v1138_v34, %v1140_v6  ;;  %v1146_v20 = vadd.f32 %v1141_v42, %v1122_v10 }
 0x514   :  { %v1147_v35 = vadd.f32 %v1142_v46, %v1123_v7 }
 0x515   :  { %v1160_v14 = vpop.permute.xlu1 %1159 }
 0x516   :  { %v1162_v4 = vpop.permute.xlu0 %1161 }
 0x517   :  { %v1165_v59 = vsel %vm217_vm5, %v1160_v14, %v1162_v4 }
 0x518   :  { %v1170_v2 = vadd.f32 %v1165_v59, %v1146_v20 }
 0x519   :  { %v1164_v40 = vpop.permute.xlu1 %1163 }
 0x51a   :  { %v1172_v18 = vadd.f32 %v1164_v40, %v1148_v30  ;;  %v1166_v25 = vsel %vm217_vm5, %v1162_v4, %v1164_v40 }
 0x51b   :  { %v1171_v62 = vadd.f32 %v1166_v25, %v1147_v35 }
 0x51d   :  { %v1184_v43 = vpop.permute.xlu1 %1183 }
 0x521   :  { %v1186_v36 = vpop.permute.xlu1 %1185 }
 0x522   :  { %v1189_v21 = vsel %vm242_vm6, %v1184_v43, %v1186_v36 }
 0x523   :  { %v1194_v15 = vadd.f32 %v1189_v21, %v1170_v2 }
 0x525   :  { %v1208_v50 = vpop.permute.xlu1 %1207 }
 0x527   :  { %v1274_v11 = vpop.permute.xlu0 %1273 }
 0x528   :  { %v1278_v16 = vmul.f32 %v1274_v11, %v2631_v22 }
 0x529   :  { %v1212_v26 = vpop.permute.xlu1 %1211 }
 0x52b   :  { %v1188_v52 = vpop.permute.xlu0 %1187 }
 0x52c   :  { %v1196_v23 = vadd.f32 %v1188_v52, %v1172_v18  ;;  %v1190_v60 = vsel %vm242_vm6, %v1186_v36, %v1188_v52 }
 0x52d   :  { %v1234_v53 = vpop.permute.xlu1 %1233  ;;  %v1195_v48 = vadd.f32 %v1190_v60, %v1171_v62 }
 0x52e   :  { %v1220_v39 = vadd.f32 %v1212_v26, %v1196_v23 }
 0x52f   :  { %v1210_v41 = vpop.permute.xlu0 %1209 }
 0x530   :  { %v1213_v27 = vsel %vm267_vm7, %v1208_v50, %v1210_v41  ;;  %v1214_v24 = vsel %vm267_vm7, %v1210_v41, %v1212_v26  ;;  %v1276_v50 = vmul.f32 %v1274_v11, %v2622_v31  ;;  %v1277_v26 = vmul.f32 %v1274_v11, %v2612_v49 }
 0x531   :  { %v1293_v9 = vpop.permute.xlu1 %1292  ;;  %v1218_v14 = vadd.f32 %v1213_v27, %v1194_v15  ;;  %v1219_v61 = vadd.f32 %v1214_v24, %v1195_v48 }
 0x533   :  { %v1232_v8 = vpop.permute.xlu0 %1231 }
 0x534   :  { %v1237_v19 = vsel %vm292_vm8, %v1232_v8, %v1234_v53 }
 0x535   :  { %v2722_v28 = vpop.permute.xlu1 %1296  ;;  %v1242_v43 = vadd.f32 %v1237_v19, %v1218_v14 }
 0x537   :  { %v1236_v29 = vpop.permute.xlu0 %1235  ;;  %v1279_v33 = vadd.f32 %v1276_v50, %v1242_v43 }
 0x538   :  { %v1244_v63 = vadd.f32 %v1236_v29, %v1220_v39  ;;  %v1238_v34 = vsel %vm292_vm8, %v1234_v53, %v1236_v29 }
 0x539   :  { %v2724_v13 = vpop.permute.xlu1 %1318  ;;  %v1243_v36 = vadd.f32 %v1238_v34, %v1219_v61 }
 0x53a   :  { %v1281_v40 = vadd.f32 %v1278_v16, %v1244_v63 }
 0x53b   :  { %v1295_v54 = vpop.permute.xlu0 %1294  ;;  %v1280_v8 = vadd.f32 %v1277_v26, %v1243_v36 }
 0x53c   :  { %v1305_v52 = vadd.f32 %v2722_v28, %v1281_v40  ;;  %v1298_v41 = vsel %vm117_vm1, %v1293_v9, %v1295_v54  ;;  %v1299_v29 = vsel %vm117_vm1, %v1295_v54, %v2722_v28 }
 0x53d   :  { %v2726_v3 = vpop.permute.xlu1 %1340  ;;  %v1303_v55 = vadd.f32 %v1298_v41, %v1279_v33  ;;  %v1304_v11 = vadd.f32 %v1299_v29, %v1280_v8 }
 0x53f   :  { %v1317_v47 = vpop.permute.xlu0 %1316 }
 0x540   :  { %v1322_v30 = vsel %vm142_vm2, %v1317_v47, %v2724_v13 }
 0x541   :  { %v2728_v5 = vpop.permute.xlu1 %1344  ;;  %v1327_v9 = vadd.f32 %v1322_v30, %v1303_v55 }
 0x543   :  { %v1321_v38 = vpop.permute.xlu0 %1320 }
 0x544   :  { %v1329_v17 = vadd.f32 %v1321_v38, %v1305_v52  ;;  %v1323_v49 = vsel %vm142_vm2, %v2724_v13, %v1321_v38 }
 0x545   :  { %v2732_v56 = vpop.permute.xlu1 %1366  ;;  %v1328_v54 = vadd.f32 %v1323_v49, %v1304_v11 }
 0x546   :  { %v1353_v18 = vadd.f32 %v2728_v5, %v1329_v17 }
 0x547   :  { %v1343_v12 = vpop.permute.xlu0 %1342 }
 0x548   :  { %v1346_v31 = vsel %vm167_vm3, %v2726_v3, %v1343_v12  ;;  %v1347_v37 = vsel %vm167_vm3, %v1343_v12, %v2728_v5 }
 0x549   :  { %v1389_v57 = vpop.permute.xlu1 %1388  ;;  %v1351_v47 = vadd.f32 %v1346_v31, %v1327_v9  ;;  %v1352_v3 = vadd.f32 %v1347_v37, %v1328_v54 }
 0x54b   :  { %v1365_v51 = vpop.permute.xlu0 %1364 }
 0x54c   :  { %v1370_v28 = vsel %vm192_vm4, %v1365_v51, %v2732_v56 }
 0x54d   :  { %v1393_v45 = vpop.permute.xlu1 %1392  ;;  %v1375_v1 = vadd.f32 %v1370_v28, %v1351_v47 }
 0x54f   :  { %v1369_v32 = vpop.permute.xlu0 %1368 }
 0x550   :  { %v1377_v58 = vadd.f32 %v1369_v32, %v1353_v18  ;;  %v1371_v13 = vsel %vm192_vm4, %v2732_v56, %v1369_v32 }
 0x551   :  { %v1415_v6 = vpop.permute.xlu1 %1414  ;;  %v1376_v5 = vadd.f32 %v1371_v13, %v1352_v3 }
 0x552   :  { %v1401_v7 = vadd.f32 %v1393_v45, %v1377_v58 }
 0x553   :  { %v1391_v4 = vpop.permute.xlu0 %1390 }
 0x554   :  { %v1394_v38 = vsel %vm217_vm5, %v1389_v57, %v1391_v4  ;;  %v1395_v46 = vsel %vm217_vm5, %v1391_v4, %v1393_v45 }
 0x555   :  { %v1437_v22 = vpop.permute.xlu1 %1436  ;;  %v1399_v12 = vadd.f32 %v1394_v38, %v1375_v1  ;;  %v1400_v20 = vadd.f32 %v1395_v46, %v1376_v5 }
 0x557   :  { %v1413_v53 = vpop.permute.xlu0 %1412 }
 0x558   :  { %v1418_v10 = vsel %vm242_vm6, %v1413_v53, %v1415_v6 }
 0x559   :  { %v1441_v0 = vpop.permute.xlu1 %1440  ;;  %v1423_v35 = vadd.f32 %v1418_v10, %v1399_v12 }
 0x55b   :  { %v1417_v44 = vpop.permute.xlu0 %1416 }
 0x55c   :  { %v1419_v59 = vsel %vm242_vm6, %v1415_v6, %v1417_v44  ;;  %v1425_v56 = vadd.f32 %v1417_v44, %v1401_v7 }
 0x55d   :  { %v1463_v23 = vpop.permute.xlu1 %1462  ;;  %v1424_v60 = vadd.f32 %v1419_v59, %v1400_v20 }
 0x55e   :  { %v1449_v27 = vadd.f32 %v1441_v0, %v1425_v56 }
 0x55f   :  { %v1439_v42 = vpop.permute.xlu0 %1438 }
 0x560   :  { %v1442_v25 = vsel %vm267_vm7, %v1437_v22, %v1439_v42  ;;  %v1443_v51 = vsel %vm267_vm7, %v1439_v42, %v1441_v0 }
 0x561   :  { %v1481_v57 = vpop.permute.xlu1 %1480  ;;  %v1447_v2 = vadd.f32 %v1442_v25, %v1423_v35  ;;  %v1448_v62 = vadd.f32 %v1443_v51, %v1424_v60 }
 0x563   :  { %v1461_v39 = vpop.permute.xlu0 %1460 }
 0x564   :  { %v1466_v21 = vsel %vm292_vm8, %v1461_v39, %v1463_v23 }
 0x565   :  { %v1471_v63 = vadd.f32 %v1466_v21, %v1447_v2  ;;  %v1485_v48 = vpop.permute.xlu1 %1484 }
 0x567   :  { %v1465_v24 = vpop.permute.xlu0 %1464  ;;  %v1474_v32 = vmax.f32 %v1471_v63, 0.0 }
 0x568   :  { %v1467_v45 = vsel %vm292_vm8, %v1463_v23, %v1465_v24  ;;  %v1473_v16 = vadd.f32 %v1465_v24, %v1449_v27 }
 0x569   :  { %v1472_v15 = vadd.f32 %v1467_v45, %v1448_v62 }
 0x56a   :  { %v1476_v40 = vmax.f32 %v1473_v16, 0.0 }
 0x56b   :  { %v1475_v19 = vmax.f32 %v1472_v15, 0.0  ;;  %v1483_v34 = vpop.permute.xlu0 %1482 }
 0x56c   :  { %v1486_v14 = vsel %vm292_vm8, %v1481_v57, %v1483_v34  ;;  %v1487_v61 = vsel %vm292_vm8, %v1483_v34, %v1485_v48  ;;  %v1493_v36 = vadd.f32 %v1485_v48, %v1476_v40 }
 0x56d   :  { %v1491_v6 = vadd.f32 %v1486_v14, %v1474_v32  ;;  %v1492_v43 = vadd.f32 %v1487_v61, %v1475_v19 }
 0x56f   :  { %1499 = vrot.lane.b32.xlu1 %v1492_v43, %s1737_s4  ;;  %1497 = vrot.lane.b32.xlu0 %v1491_v6, %s1737_s4 }
 0x573   :  { %1501 = vrot.lane.b32.xlu0 %v1493_v36, %s1737_s4 }
 0x5e1   :  { %v1500_v4 = vpop.permute.xlu1 %1499  ;;  %v1498_v50 = vpop.permute.xlu0 %1497 }
 0x5e2   :  { %v1504_v26 = vsel %vm1503_vm10, %v1498_v50, %v1500_v4 }
 0x5e3   :  { %1509 = vst [vmem:[#allocation7] sm:$0x3f] %v1504_v26 }
 0x5e5   :  { %v1502_v52 = vpop.permute.xlu0 %1501 }
 0x5e6   :  { %v1505_v22 = vsel %vm1503_vm10, %v1500_v4, %v1502_v52  ;;  %1512 = vst.msk [vmem:[#allocation7 + $0x10] sm:$0x3f] %vm1511_vm11, %v1502_v52 }
 0x5e7   :  { %1510 = vst [vmem:[#allocation7 + $0x8] sm:$0x3f] %v1505_v22 }
 0x5e8   :  { %1682 = shalt.err (!%p1679_p6)
}
 0x5e9   :  { %s1683_s18 = scalar_lea.hbm %s2794_s6, 384 }
 0x5ea   :  { %p1684_p7 = scmp.ne.s32.totalorder %s2794_s6, %s1683_s18  ;;  %p1687_p8 = scmp.lt.u32.totalorder %s1683_s18, %s2794_s6 }
 0x5ec   :  { %p1689_p9 = pnand %p1687_p8, %p1684_p7 }
 0x5ee   :  { %1692 = shalt.err (!%p1689_p9)
}
 0x5ef   :  { %1522 = dma.vmem_to_hbm [thread:$0]  %s1520_s14, 384, %s2794_s6, [#allocation4]  }
 0x5f0   :  { %1697 = dma.done.wait [#allocation4], 384  }
 0x5f1   :  { %1698 = vsyncadd [#allocation4], 4294966912 }
 0x5f2   :  { %1526 = vsyncpa [#allocation3], 1 }
 0x5f3   :  { %1527 = vsyncpa [#allocation6], 1 }
 0x5f4   :  { %1528 = vsyncpa [#allocation4], 1 }

</bundles_post_ra>
